<compile_context>
chip_gen: v7x
topology: tpu7x:2x2x1
jax: 0.10.0
libtpu: 0.0.40
codegen_flags: <defaults>
</compile_context>

<pallas_src>
import functools

import jax
import jax.numpy as jnp
from jax.experimental import pallas as pl
from jax.experimental.pallas import tpu as pltpu


# ------------------------------- helpers -----------------------------------

def _round_up(x, m):
    return ((x + m - 1) // m) * m


def _pad_k(k):
    """Padded K so that the K tile (<=4096) divides it exactly."""
    kp = _round_up(k, 128)
    if kp > 4096:
        kp = _round_up(k, 4096)
    return kp


def _pick_tm(m):
    """M tile (multiple of 8, <= 256) and padded M such that tm | Mp."""
    if m % 8 == 0:
        tm = 8
        for cand in range(16, 257, 8):
            if m % cand == 0:
                tm = cand
        return tm, m
    mp = _round_up(m, 8)
    tm = 128 if mp >= 128 else mp
    return tm, _round_up(mp, tm)


def _zero_map(n):
    return lambda: (0,) * n


# --------------------------- tiled MXU matmul -------------------------------

def _matmul_kernel(x_ref, w_ref, b_ref, o_ref, acc_ref, *, relu):
    @pl.when(pl.program_id(2) == 0)
    def _():
        acc_ref[...] = jnp.zeros_like(acc_ref)

    acc_ref[...] += jnp.dot(x_ref[...], w_ref[...],
                            preferred_element_type=jnp.float32)

    @pl.when(pl.program_id(2) == pl.num_programs(2) - 1)
    def _():
        out = acc_ref[...] + b_ref[...]
        if relu:
            out = jnp.maximum(out, 0.0)
        o_ref[...] = out.astype(o_ref.dtype)


def linear_padded(x, wp, bp, *, relu=False):
    """x: (M, K); wp: pre-padded (Kp, Np) weight; bp: (1, Np) f32 bias.
    Returns the PADDED (Mp, Np) f32 result (callers slice if needed)."""
    m, k = x.shape
    kp, np_ = wp.shape
    tm, mp = _pick_tm(m)
    tn = 128
    tk = kp if kp <= 4096 else 4096          # fits double-buffered in <=16 MiB
    assert kp % tk == 0 and np_ % tn == 0 and mp % tm == 0
    xp = jnp.zeros((mp, kp), wp.dtype).at[:m, :k].set(x.astype(wp.dtype))
    grid = (mp // tm, np_ // tn, kp // tk)
    return pl.pallas_call(
        functools.partial(_matmul_kernel, relu=relu),
        out_shape=jax.ShapeDtypeStruct((mp, np_), jnp.float32),
        grid_spec=pltpu.PrefetchScalarGridSpec(
            num_scalar_prefetch=0,
            grid=grid,
            in_specs=[
                pl.BlockSpec((tm, tk), lambda i, j, kk: (i, kk)),
                pl.BlockSpec((tk, tn), lambda i, j, kk: (kk, j)),
                pl.BlockSpec((1, tn), lambda i, j, kk: (0, j)),
            ],
            out_specs=pl.BlockSpec((tm, tn), lambda i, j, kk: (i, j)),
            scratch_shapes=[pltpu.VMEM((tm, tn), jnp.float32)],
        ),
        compiler_params=pltpu.CompilerParams(
            dimension_semantics=("parallel", "parallel", "arbitrary"),
            vmem_limit_bytes=32 * 1024 * 1024,
        ),
    )(xp, wp, bp)


# ---------------------- fused 2x2 max-pool + ReLU ---------------------------

def _pool_relu_kernel(x_ref, o_ref):
    wo = x_ref.shape[2]
    w2 = wo // 2
    # max over the row (H) pair — static major-dim indexing.
    y = jnp.maximum(x_ref[0, 0], x_ref[0, 1])                  # (wo, Cp)
    # even/odd column selection via one-hot matmuls on the otherwise-idle MXU
    # (avoids strided sublane loads / in-kernel reshapes).
    r = jax.lax.broadcasted_iota(jnp.int32, (w2, wo), 0)
    c = jax.lax.broadcasted_iota(jnp.int32, (w2, wo), 1)
    even = (c == 2 * r).astype(jnp.float32)
    odd = (c == 2 * r + 1).astype(jnp.float32)
    pooled = jnp.maximum(
        jnp.dot(even, y, preferred_element_type=jnp.float32),
        jnp.dot(odd, y, preferred_element_type=jnp.float32))
    o_ref[0, 0] = jnp.maximum(pooled, 0.0)                     # ReLU


def maxpool2x2_relu(x):
    """x: (B, H, W, Cp) f32, H/W even, Cp lane-dense -> (B, H//2, W//2, Cp)."""
    B, H, W, Cp = x.shape
    H2, W2 = H // 2, W // 2
    return pl.pallas_call(
        _pool_relu_kernel,
        out_shape=jax.ShapeDtypeStruct((B, H2, W2, Cp), jnp.float32),
        grid=(B, H2),
        in_specs=[pl.BlockSpec((1, 2, W, Cp), lambda b, h: (b, h, 0, 0))],
        out_specs=pl.BlockSpec((1, 1, W2, Cp), lambda b, h: (b, h, 0, 0)),
        compiler_params=pltpu.CompilerParams(
            dimension_semantics=("parallel", "parallel")),
    )(x)


# --------------- fused tail: scalar MLP + fc1-tail + fc2 + fc3 --------------

def _tail_kernel(sf_ref, mw_ref, mb_ref, w1t_ref, part_ref, w2_ref, b2_ref,
                 w3_ref, b3_ref, o_ref):
    # 5-layer scalar MLP (zero-padded to 128 lanes), all weights in VMEM.
    h = sf_ref[...]
    for l in range(mw_ref.shape[0]):
        h = jnp.maximum(
            jnp.dot(h, mw_ref[l], preferred_element_type=jnp.float32)
            + mb_ref[l], 0.0)
    # fc1 = (conv part, precomputed with bias) + (MLP part), then ReLU.
    f1 = jnp.maximum(
        part_ref[...]
        + jnp.dot(h, w1t_ref[...], preferred_element_type=jnp.float32), 0.0)
    f2 = jnp.maximum(
        jnp.dot(f1, w2_ref[...], preferred_element_type=jnp.float32)
        + b2_ref[...], 0.0)
    o_ref[...] = (jnp.dot(f2, w3_ref[...], preferred_element_type=jnp.float32)
                  + b3_ref[...])


def fc_tail(sf, part, prep):
    B = sf.shape[0]
    mp = part.shape[0]
    sfp = jnp.zeros((mp, 128), jnp.float32).at[:B, 0].set(sf.astype(jnp.float32))
    inputs = (sfp, prep["mlp_wp"], prep["mlp_bp"], prep["fc1_tail_wp"], part,
              prep["fc2_wp"], prep["fc2_bp"], prep["fc3_wp"], prep["fc3_bp"])
    return pl.pallas_call(
        _tail_kernel,
        out_shape=jax.ShapeDtypeStruct((mp, 128), jnp.float32),
        in_specs=[pl.BlockSpec(a.shape, _zero_map(a.ndim)) for a in inputs],
        out_specs=pl.BlockSpec((mp, 128), _zero_map(2)),
    )(*inputs)


# --------------------------- conv as im2col ---------------------------------

def conv2d_nhwc(x, wp, bp, kh, kw):
    """x: (B, H, W, C) bf16; wp: pre-padded bf16 weight, rows in (i, j, c)
    order.  Returns (B, Hu, Wu, Np) f32 where Hu/Wu are the even output
    extents actually consumed by the following 2x2 pool."""
    B, H, W, C = x.shape
    Ho, Wo = H - kh + 1, W - kw + 1
    Hu, Wu = (Ho // 2) * 2, (Wo // 2) * 2
    # TODO(synk): fuse the im2col patch assembly into the matmul kernel via
    # overlapping-window BlockSpecs to cut activation HBM traffic further.
    cols = [x[:, i:i + Hu, j:j + Wu, :] for i in range(kh) for j in range(kw)]
    patches = jnp.concatenate(cols, axis=-1).reshape(B * Hu * Wu, kh * kw * C)
    out = linear_padded(patches, wp, bp, relu=False)          # (Mp, Np) f32
    return out[:B * Hu * Wu].reshape(B, Hu, Wu, wp.shape[1])


# ------------------------------ parameters ----------------------------------

def conv_spatial(image_size):
    kh1 = image_size // 16
    h, w = image_size - kh1 + 1, image_size - 2 + 1   # conv1
    h, w = h // 2, w // 2                             # pool1
    h, w = h - 3, w - 3                               # conv2 (4x4)
    return h // 2, w // 2                             # pool2


def conv_out_flat_size(num_filters, image_size):
    h, w = conv_spatial(image_size)
    return 2 * num_filters * h * w


def _lin_init(key, fan_in, fan_out):
    kw, kb = jax.random.split(key)
    bound = 1.0 / jnp.sqrt(fan_in)
    w = jax.random.uniform(kw, (fan_in, fan_out), jnp.float32, -bound, bound)
    b = jax.random.uniform(kb, (fan_out,), jnp.float32, -bound, bound)
    return w, b


def _conv_init(key, cout, cin, kh, kw):
    kk, kb = jax.random.split(key)
    fan_in = cin * kh * kw
    bound = 1.0 / jnp.sqrt(fan_in)
    w = jax.random.uniform(kk, (cout, cin, kh, kw), jnp.float32, -bound, bound)
    b = jax.random.uniform(kb, (cout,), jnp.float32, -bound, bound)
    return w, b


def init_params(key, in_channels, num_filters, image_size):
    keys = jax.random.split(key, 16)
    p = {}
    kh1 = image_size // 16
    p["conv1_w"], p["conv1_b"] = _conv_init(keys[0], num_filters, in_channels, kh1, 2)
    p["conv2_w"], p["conv2_b"] = _conv_init(keys[1], num_filters * 2, num_filters, 4, 4)
    for name, c in (("bn1", num_filters), ("bn2", num_filters * 2)):
        p[f"{name}_gamma"] = jnp.ones((c,), jnp.float32)
        p[f"{name}_beta"] = jnp.zeros((c,), jnp.float32)
        p[f"{name}_mean"] = jnp.zeros((c,), jnp.float32)
        p[f"{name}_var"] = jnp.ones((c,), jnp.float32)
    hidden = 10
    dims = [1] + [hidden] * 5
    p["mlp"] = [_lin_init(keys[2 + i], dims[i], dims[i + 1]) for i in range(5)]
    fc_in = conv_out_flat_size(num_filters, image_size) + hidden
    p["fc1"] = _lin_init(keys[8], fc_in, 150)
    p["fc2"] = _lin_init(keys[9], 150, 84)
    p["fc3"] = _lin_init(keys[10], 84, 1)
    return p


def _prep_weight(w, b, dtype):
    k, n = w.shape
    kp, np_ = _pad_k(k), _round_up(n, 128)
    wp = jnp.zeros((kp, np_), dtype).at[:k, :n].set(w.astype(dtype))
    bp = jnp.zeros((1, np_), jnp.float32).at[0, :n].set(b.astype(jnp.float32))
    return wp, bp


def prepare_params(p, in_channels, num_filters, image_size, eps=1e-5):
    """One-time: fold eval-mode BN into conv weights, reorder fc1 rows for the
    NHWC flatten order, pad/cast everything to its final kernel layout."""
    prep = {}
    for name, bn in (("conv1", "bn1"), ("conv2", "bn2")):
        w, b = p[f"{name}_w"], p[f"{name}_b"]
        scale = p[f"{bn}_gamma"] / jnp.sqrt(p[f"{bn}_var"] + eps)
        shift = p[f"{bn}_beta"] - p[f"{bn}_mean"] * scale
        # Folding BN (applied after the pool) into the conv is exact only when
        # scale > 0 (positive scale + constant shift commute with max-pool).
        assert bool(jnp.all(scale > 0)), "BN fold requires positive scale"
        wf = w * scale[:, None, None, None]
        bf = b * scale + shift
        cout, cin, kh, kw = w.shape
        wmat = jnp.transpose(wf, (2, 3, 1, 0)).reshape(kh * kw * cin, cout)
        prep[f"{name}_wp"], prep[f"{name}_bp"] = _prep_weight(wmat, bf, jnp.bfloat16)

    c2 = 2 * num_filters
    hh, ww = conv_spatial(image_size)
    flat = c2 * hh * ww
    w1, b1 = p["fc1"]
    # fc1 rows for conv features: PyTorch flatten is (c, h, w); ours is (h, w, c).
    head = w1[:flat].reshape(c2, hh, ww, w1.shape[1])
    head = head.transpose(1, 2, 0, 3).reshape(flat, w1.shape[1])
    prep["fc1_head_wp"], prep["fc1_bp"] = _prep_weight(head, b1, jnp.bfloat16)
    tail = w1[flat:]
    prep["fc1_tail_wp"] = (jnp.zeros((128, 256), jnp.float32)
                           .at[:tail.shape[0], :tail.shape[1]].set(tail))

    mw = jnp.zeros((5, 128, 128), jnp.float32)
    mb = jnp.zeros((5, 1, 128), jnp.float32)
    for l, (wl, bl) in enumerate(p["mlp"]):
        mw = mw.at[l, :wl.shape[0], :wl.shape[1]].set(wl)
        mb = mb.at[l, 0, :bl.shape[0]].set(bl)
    prep["mlp_wp"], prep["mlp_bp"] = mw, mb

    w2, b2 = p["fc2"]
    w3, b3 = p["fc3"]
    prep["fc2_wp"] = jnp.zeros((256, 128), jnp.float32).at[:w2.shape[0], :w2.shape[1]].set(w2)
    prep["fc2_bp"] = jnp.zeros((1, 128), jnp.float32).at[0, :b2.shape[0]].set(b2)
    prep["fc3_wp"] = jnp.zeros((128, 128), jnp.float32).at[:w3.shape[0], :w3.shape[1]].set(w3)
    prep["fc3_bp"] = jnp.zeros((1, 128), jnp.float32).at[0, :b3.shape[0]].set(b3)
    return prep


# -------------------------------- forward -----------------------------------

def cnn_forward(prep, image, sf_vol_frac, *, c1, c2, k1, k2):
    B = image.shape[0]
    x = jnp.transpose(image, (0, 2, 3, 1)).astype(jnp.bfloat16)   # NCHW -> NHWC
    # conv1 (BN folded) -> 2x2 max-pool -> ReLU
    x = conv2d_nhwc(x, prep["conv1_wp"], prep["conv1_bp"], *k1)
    x = maxpool2x2_relu(x)[:, :, :, :c1]
    # conv2 (BN folded) -> 2x2 max-pool -> ReLU
    x = conv2d_nhwc(x.astype(jnp.bfloat16), prep["conv2_wp"], prep["conv2_bp"], *k2)
    x = maxpool2x2_relu(x)[:, :, :, :c2]
    conv_flat = x.reshape(B, -1)                    # (B, F), (h, w, c) order
    # fc1 conv part (bias included) on the tiled MXU matmul.
    part = linear_padded(conv_flat, prep["fc1_head_wp"], prep["fc1_bp"], relu=False)
    # fused: scalar MLP + fc1 MLP-part + ReLU + fc2 + ReLU + fc3.
    out = fc_tail(sf_vol_frac, part, prep)
    return out[:B, :1]


if __name__ == "__main__":
    B, IN_CH, NUM_FILTERS, IMAGE_SIZE = 2, 4, 4, 32
    key = jax.random.PRNGKey(0)
    k_img, k_sf, k_par = jax.random.split(key, 3)
    image = jax.random.normal(k_img, (B, IN_CH, IMAGE_SIZE, IMAGE_SIZE), jnp.float32)
    sf_vol_frac = jax.random.normal(k_sf, (B,), jnp.float32)

    params = init_params(k_par, IN_CH, NUM_FILTERS, IMAGE_SIZE)
    prep = prepare_params(params, IN_CH, NUM_FILTERS, IMAGE_SIZE)

    fwd = jax.jit(functools.partial(
        cnn_forward, c1=NUM_FILTERS, c2=2 * NUM_FILTERS,
        k1=(IMAGE_SIZE // 16, 2), k2=(4, 4)))
    out = fwd(prep, image, sf_vol_frac)
    jax.block_until_ready(out)
    assert out.shape == (B, 1) and out.dtype == jnp.float32
    print("KERNEL_OK")
</pallas_src>

<mosaic_0001>
module attributes {stable_mosaic.version = 11 : i64} {
  func.func @_matmul_kernel(%arg0: i32, %arg1: i32, %arg2: i32, %arg3: memref<200x128xbf16, #tpu.memory_space<vmem>>, %arg4: memref<128x128xbf16, #tpu.memory_space<vmem>>, %arg5: memref<1x128xf32, #tpu.memory_space<vmem>>, %arg6: memref<200x128xf32, #tpu.memory_space<vmem>>, %arg7: memref<200x128xf32, #tpu.memory_space<vmem>>) attributes {dimension_semantics = [#tpu.dimension_semantics<parallel>, #tpu.dimension_semantics<parallel>, #tpu.dimension_semantics<arbitrary>], iteration_bounds = array<i64: 9, 1, 1>, scalar_prefetch = 0 : i64, scratch_operands = 1 : i64, tpu.core_type = #tpu.core_type<tc>, window_params = [{transform_indices = @transform_0, window_bounds = array<i64: 200, 128>}, {transform_indices = @transform_1, window_bounds = array<i64: 128, 128>}, {transform_indices = @transform_2, window_bounds = array<i64: 1, 128>}, {transform_indices = @transform_3, window_bounds = array<i64: 200, 128>}]} {
    %c0_i32 = arith.constant 0 : i32
    %0 = arith.cmpi eq, %arg2, %c0_i32 : i32
    %1 = arith.extui %0 : i1 to i32
    %c0_i32_0 = arith.constant 0 : i32
    %2 = arith.cmpi ne, %1, %c0_i32_0 : i32
    scf.if %2 {
      %cst_10 = arith.constant 0.000000e+00 : f32
      %12 = vector.broadcast %cst_10 : f32 to vector<200x128xf32>
      %c0_11 = arith.constant 0 : index
      %c0_12 = arith.constant 0 : index
      %13 = vector.load %arg7[%c0_11, %c0_12] : memref<200x128xf32, #tpu.memory_space<vmem>>, vector<200x128xf32>
      tpu.vector_store %arg7[%c0_11, %c0_12], %12 {strides = array<i32>} : memref<200x128xf32, #tpu.memory_space<vmem>>, vector<200x128xf32>,
    } else {
    }
    %c0 = arith.constant 0 : index
    %c0_1 = arith.constant 0 : index
    %3 = vector.load %arg7[%c0, %c0_1] : memref<200x128xf32, #tpu.memory_space<vmem>>, vector<200x128xf32>
    %c0_2 = arith.constant 0 : index
    %c0_3 = arith.constant 0 : index
    %4 = vector.load %arg3[%c0_2, %c0_3] : memref<200x128xbf16, #tpu.memory_space<vmem>>, vector<200x128xbf16>
    %c0_4 = arith.constant 0 : index
    %c0_5 = arith.constant 0 : index
    %5 = vector.load %arg4[%c0_4, %c0_5] : memref<128x128xbf16, #tpu.memory_space<vmem>>, vector<128x128xbf16>
    %cst = arith.constant dense<0.000000e+00> : vector<200x128xf32>
    %6 = tpu.matmul %4, %5, %cst {dimension_numbers = #tpu.dot_dimension_numbers<[1], [0], [0], [1], [0, 0, 1, 1], [], []>} : vector<200x128xbf16>, vector<128x128xbf16>, vector<200x128xf32> -> vector<200x128xf32>
    %7 = arith.addf %3, %6 : vector<200x128xf32>
    %c0_6 = arith.constant 0 : index
    %c0_7 = arith.constant 0 : index
    %8 = vector.load %arg7[%c0_6, %c0_7] : memref<200x128xf32, #tpu.memory_space<vmem>>, vector<200x128xf32>
    tpu.vector_store %arg7[%c0_6, %c0_7], %7 {strides = array<i32>} : memref<200x128xf32, #tpu.memory_space<vmem>>, vector<200x128xf32>,
    %c0_i32_8 = arith.constant 0 : i32
    %9 = arith.cmpi eq, %arg2, %c0_i32_8 : i32
    %10 = arith.extui %9 : i1 to i32
    %c0_i32_9 = arith.constant 0 : i32
    %11 = arith.cmpi ne, %10, %c0_i32_9 : i32
    scf.if %11 {
      %c0_10 = arith.constant 0 : index
      %c0_11 = arith.constant 0 : index
      %12 = vector.load %arg7[%c0_10, %c0_11] : memref<200x128xf32, #tpu.memory_space<vmem>>, vector<200x128xf32>
      %c0_12 = arith.constant 0 : index
      %c0_13 = arith.constant 0 : index
      %13 = vector.load %arg5[%c0_12, %c0_13] : memref<1x128xf32, #tpu.memory_space<vmem>>, vector<1x128xf32>
      %14 = vector.broadcast %13 : vector<1x128xf32> to vector<200x128xf32>
      %15 = arith.addf %12, %14 : vector<200x128xf32>
      %c0_14 = arith.constant 0 : index
      %c0_15 = arith.constant 0 : index
      %16 = vector.load %arg6[%c0_14, %c0_15] : memref<200x128xf32, #tpu.memory_space<vmem>>, vector<200x128xf32>
      tpu.vector_store %arg6[%c0_14, %c0_15], %15 {strides = array<i32>} : memref<200x128xf32, #tpu.memory_space<vmem>>, vector<200x128xf32>,
    } else {
    }
    return
  }
  func.func @transform_0(%arg0: i32, %arg1: i32, %arg2: i32) -> (i32, i32) {
    %c0_i32 = arith.constant 0 : i32
    return %arg0, %arg2 : i32, i32
  }
  func.func @transform_1(%arg0: i32, %arg1: i32, %arg2: i32) -> (i32, i32) {
    %c0_i32 = arith.constant 0 : i32
    return %arg2, %arg1 : i32, i32
  }
  func.func @transform_2(%arg0: i32, %arg1: i32, %arg2: i32) -> (i32, i32) {
    %c0_i32 = arith.constant 0 : i32
    %c0_i32_0 = arith.constant 0 : i32
    return %c0_i32, %arg1 : i32, i32
  }
  func.func @transform_3(%arg0: i32, %arg1: i32, %arg2: i32) -> (i32, i32) {
    %c0_i32 = arith.constant 0 : i32
    return %arg0, %arg1 : i32, i32
  }
}

module attributes {stable_mosaic.version = 11 : i64} {
  func.func @_pool_relu_kernel(%arg0: i32, %arg1: i32, %arg2: memref<1x2x30x128xf32, #tpu.memory_space<vmem>>, %arg3: memref<1x1x15x128xf32, #tpu.memory_space<vmem>>) attributes {dimension_semantics = [#tpu.dimension_semantics<parallel>, #tpu.dimension_semantics<parallel>], iteration_bounds = array<i64: 2, 15>, scalar_prefetch = 0 : i64, scratch_operands = 0 : i64, tpu.core_type = #tpu.core_type<tc>, window_params = [{transform_indices = @transform_0, window_bounds = array<i64: 1, 2, 30, 128>}, {transform_indices = @transform_1, window_bounds = array<i64: 1, 1, 15, 128>}]} {
    %c0 = arith.constant 0 : index
    %c0_0 = arith.constant 0 : index
    %c0_1 = arith.constant 0 : index
    %c0_2 = arith.constant 0 : index
    %0 = vector.load %arg2[%c0, %c0_0, %c0_1, %c0_2] : memref<1x2x30x128xf32, #tpu.memory_space<vmem>>, vector<1x1x30x128xf32>
    %1 = vector.shape_cast %0 : vector<1x1x30x128xf32> to vector<30x128xf32>
    %c0_3 = arith.constant 0 : index
    %c1 = arith.constant 1 : index
    %c0_4 = arith.constant 0 : index
    %c0_5 = arith.constant 0 : index
    %2 = vector.load %arg2[%c0_3, %c1, %c0_4, %c0_5] : memref<1x2x30x128xf32, #tpu.memory_space<vmem>>, vector<1x1x30x128xf32>
    %3 = vector.shape_cast %2 : vector<1x1x30x128xf32> to vector<30x128xf32>
    %4 = arith.maximumf %1, %3 : vector<30x128xf32>
    %5 = tpu.iota {dimensions = array<i32: 0>} : vector<15x30xi32>
    %6 = tpu.iota {dimensions = array<i32: 1>} : vector<15x30xi32>
    %c2_i32 = arith.constant 2 : i32
    %7 = vector.broadcast %c2_i32 : i32 to vector<15x30xi32>
    %8 = arith.muli %7, %5 : vector<15x30xi32>
    %9 = arith.cmpi eq, %6, %8 : vector<15x30xi32>
    %10 = arith.extui %9 : vector<15x30xi1> to vector<15x30xi32>
    %11 = arith.sitofp %10 : vector<15x30xi32> to vector<15x30xf32>
    %c2_i32_6 = arith.constant 2 : i32
    %12 = vector.broadcast %c2_i32_6 : i32 to vector<15x30xi32>
    %13 = arith.muli %12, %5 : vector<15x30xi32>
    %c1_i32 = arith.constant 1 : i32
    %14 = vector.broadcast %c1_i32 : i32 to vector<15x30xi32>
    %15 = arith.addi %13, %14 : vector<15x30xi32>
    %16 = arith.cmpi eq, %6, %15 : vector<15x30xi32>
    %17 = arith.extui %16 : vector<15x30xi1> to vector<15x30xi32>
    %18 = arith.sitofp %17 : vector<15x30xi32> to vector<15x30xf32>
    %cst = arith.constant dense<0.000000e+00> : vector<15x128xf32>
    %19 = tpu.matmul %11, %4, %cst {dimension_numbers = #tpu.dot_dimension_numbers<[1], [0], [0], [1], [0, 0, 1, 1], [], []>} : vector<15x30xf32>, vector<30x128xf32>, vector<15x128xf32> -> vector<15x128xf32>
    %cst_7 = arith.constant dense<0.000000e+00> : vector<15x128xf32>
    %20 = tpu.matmul %18, %4, %cst_7 {dimension_numbers = #tpu.dot_dimension_numbers<[1], [0], [0], [1], [0, 0, 1, 1], [], []>} : vector<15x30xf32>, vector<30x128xf32>, vector<15x128xf32> -> vector<15x128xf32>
    %21 = arith.maximumf %19, %20 : vector<15x128xf32>
    %cst_8 = arith.constant 0.000000e+00 : f32
    %22 = vector.broadcast %cst_8 : f32 to vector<15x128xf32>
    %23 = arith.maximumf %21, %22 : vector<15x128xf32>
    %c0_9 = arith.constant 0 : index
    %c0_10 = arith.constant 0 : index
    %c0_11 = arith.constant 0 : index
    %c0_12 = arith.constant 0 : index
    %24 = vector.load %arg3[%c0_9, %c0_10, %c0_11, %c0_12] : memref<1x1x15x128xf32, #tpu.memory_space<vmem>>, vector<1x1x15x128xf32>
    %25 = vector.shape_cast %24 : vector<1x1x15x128xf32> to vector<15x128xf32>
    %26 = vector.shape_cast %23 : vector<15x128xf32> to vector<1x1x15x128xf32>
    tpu.vector_store %arg3[%c0_9, %c0_10, %c0_11, %c0_12], %26 {strides = array<i32>} : memref<1x1x15x128xf32, #tpu.memory_space<vmem>>, vector<1x1x15x128xf32>,
    return
  }
  func.func @transform_0(%arg0: i32, %arg1: i32) -> (i32, i32, i32, i32) {
    %c0_i32 = arith.constant 0 : i32
    %c0_i32_0 = arith.constant 0 : i32
    %c0_i32_1 = arith.constant 0 : i32
    return %arg0, %arg1, %c0_i32, %c0_i32_0 : i32, i32, i32, i32
  }
  func.func @transform_1(%arg0: i32, %arg1: i32) -> (i32, i32, i32, i32) {
    %c0_i32 = arith.constant 0 : i32
    %c0_i32_0 = arith.constant 0 : i32
    %c0_i32_1 = arith.constant 0 : i32
    return %arg0, %arg1, %c0_i32, %c0_i32_0 : i32, i32, i32, i32
  }
}

module attributes {stable_mosaic.version = 11 : i64} {
  func.func @_matmul_kernel(%arg0: i32, %arg1: i32, %arg2: i32, %arg3: memref<144x128xbf16, #tpu.memory_space<vmem>>, %arg4: memref<128x128xbf16, #tpu.memory_space<vmem>>, %arg5: memref<1x128xf32, #tpu.memory_space<vmem>>, %arg6: memref<144x128xf32, #tpu.memory_space<vmem>>, %arg7: memref<144x128xf32, #tpu.memory_space<vmem>>) attributes {dimension_semantics = [#tpu.dimension_semantics<parallel>, #tpu.dimension_semantics<parallel>, #tpu.dimension_semantics<arbitrary>], iteration_bounds = array<i64: 2, 1, 1>, scalar_prefetch = 0 : i64, scratch_operands = 1 : i64, tpu.core_type = #tpu.core_type<tc>, window_params = [{transform_indices = @transform_0, window_bounds = array<i64: 144, 128>}, {transform_indices = @transform_1, window_bounds = array<i64: 128, 128>}, {transform_indices = @transform_2, window_bounds = array<i64: 1, 128>}, {transform_indices = @transform_3, window_bounds = array<i64: 144, 128>}]} {
    %c0_i32 = arith.constant 0 : i32
    %0 = arith.cmpi eq, %arg2, %c0_i32 : i32
    %1 = arith.extui %0 : i1 to i32
    %c0_i32_0 = arith.constant 0 : i32
    %2 = arith.cmpi ne, %1, %c0_i32_0 : i32
    scf.if %2 {
      %cst_10 = arith.constant 0.000000e+00 : f32
      %12 = vector.broadcast %cst_10 : f32 to vector<144x128xf32>
      %c0_11 = arith.constant 0 : index
      %c0_12 = arith.constant 0 : index
      %13 = vector.load %arg7[%c0_11, %c0_12] : memref<144x128xf32, #tpu.memory_space<vmem>>, vector<144x128xf32>
      tpu.vector_store %arg7[%c0_11, %c0_12], %12 {strides = array<i32>} : memref<144x128xf32, #tpu.memory_space<vmem>>, vector<144x128xf32>,
    } else {
    }
    %c0 = arith.constant 0 : index
    %c0_1 = arith.constant 0 : index
    %3 = vector.load %arg7[%c0, %c0_1] : memref<144x128xf32, #tpu.memory_space<vmem>>, vector<144x128xf32>
    %c0_2 = arith.constant 0 : index
    %c0_3 = arith.constant 0 : index
    %4 = vector.load %arg3[%c0_2, %c0_3] : memref<144x128xbf16, #tpu.memory_space<vmem>>, vector<144x128xbf16>
    %c0_4 = arith.constant 0 : index
    %c0_5 = arith.constant 0 : index
    %5 = vector.load %arg4[%c0_4, %c0_5] : memref<128x128xbf16, #tpu.memory_space<vmem>>, vector<128x128xbf16>
    %cst = arith.constant dense<0.000000e+00> : vector<144x128xf32>
    %6 = tpu.matmul %4, %5, %cst {dimension_numbers = #tpu.dot_dimension_numbers<[1], [0], [0], [1], [0, 0, 1, 1], [], []>} : vector<144x128xbf16>, vector<128x128xbf16>, vector<144x128xf32> -> vector<144x128xf32>
    %7 = arith.addf %3, %6 : vector<144x128xf32>
    %c0_6 = arith.constant 0 : index
    %c0_7 = arith.constant 0 : index
    %8 = vector.load %arg7[%c0_6, %c0_7] : memref<144x128xf32, #tpu.memory_space<vmem>>, vector<144x128xf32>
    tpu.vector_store %arg7[%c0_6, %c0_7], %7 {strides = array<i32>} : memref<144x128xf32, #tpu.memory_space<vmem>>, vector<144x128xf32>,
    %c0_i32_8 = arith.constant 0 : i32
    %9 = arith.cmpi eq, %arg2, %c0_i32_8 : i32
    %10 = arith.extui %9 : i1 to i32
    %c0_i32_9 = arith.constant 0 : i32
    %11 = arith.cmpi ne, %10, %c0_i32_9 : i32
    scf.if %11 {
      %c0_10 = arith.constant 0 : index
      %c0_11 = arith.constant 0 : index
      %12 = vector.load %arg7[%c0_10, %c0_11] : memref<144x128xf32, #tpu.memory_space<vmem>>, vector<144x128xf32>
      %c0_12 = arith.constant 0 : index
      %c0_13 = arith.constant 0 : index
      %13 = vector.load %arg5[%c0_12, %c0_13] : memref<1x128xf32, #tpu.memory_space<vmem>>, vector<1x128xf32>
      %14 = vector.broadcast %13 : vector<1x128xf32> to vector<144x128xf32>
      %15 = arith.addf %12, %14 : vector<144x128xf32>
      %c0_14 = arith.constant 0 : index
      %c0_15 = arith.constant 0 : index
      %16 = vector.load %arg6[%c0_14, %c0_15] : memref<144x128xf32, #tpu.memory_space<vmem>>, vector<144x128xf32>
      tpu.vector_store %arg6[%c0_14, %c0_15], %15 {strides = array<i32>} : memref<144x128xf32, #tpu.memory_space<vmem>>, vector<144x128xf32>,
    } else {
    }
    return
  }
  func.func @transform_0(%arg0: i32, %arg1: i32, %arg2: i32) -> (i32, i32) {
    %c0_i32 = arith.constant 0 : i32
    return %arg0, %arg2 : i32, i32
  }
  func.func @transform_1(%arg0: i32, %arg1: i32, %arg2: i32) -> (i32, i32) {
    %c0_i32 = arith.constant 0 : i32
    return %arg2, %arg1 : i32, i32
  }
  func.func @transform_2(%arg0: i32, %arg1: i32, %arg2: i32) -> (i32, i32) {
    %c0_i32 = arith.constant 0 : i32
    %c0_i32_0 = arith.constant 0 : i32
    return %c0_i32, %arg1 : i32, i32
  }
  func.func @transform_3(%arg0: i32, %arg1: i32, %arg2: i32) -> (i32, i32) {
    %c0_i32 = arith.constant 0 : i32
    return %arg0, %arg1 : i32, i32
  }
}

module attributes {stable_mosaic.version = 11 : i64} {
  func.func @_pool_relu_kernel(%arg0: i32, %arg1: i32, %arg2: memref<1x2x12x128xf32, #tpu.memory_space<vmem>>, %arg3: memref<1x1x6x128xf32, #tpu.memory_space<vmem>>) attributes {dimension_semantics = [#tpu.dimension_semantics<parallel>, #tpu.dimension_semantics<parallel>], iteration_bounds = array<i64: 2, 6>, scalar_prefetch = 0 : i64, scratch_operands = 0 : i64, tpu.core_type = #tpu.core_type<tc>, window_params = [{transform_indices = @transform_0, window_bounds = array<i64: 1, 2, 12, 128>}, {transform_indices = @transform_1, window_bounds = array<i64: 1, 1, 6, 128>}]} {
    %c0 = arith.constant 0 : index
    %c0_0 = arith.constant 0 : index
    %c0_1 = arith.constant 0 : index
    %c0_2 = arith.constant 0 : index
    %0 = vector.load %arg2[%c0, %c0_0, %c0_1, %c0_2] : memref<1x2x12x128xf32, #tpu.memory_space<vmem>>, vector<1x1x12x128xf32>
    %1 = vector.shape_cast %0 : vector<1x1x12x128xf32> to vector<12x128xf32>
    %c0_3 = arith.constant 0 : index
    %c1 = arith.constant 1 : index
    %c0_4 = arith.constant 0 : index
    %c0_5 = arith.constant 0 : index
    %2 = vector.load %arg2[%c0_3, %c1, %c0_4, %c0_5] : memref<1x2x12x128xf32, #tpu.memory_space<vmem>>, vector<1x1x12x128xf32>
    %3 = vector.shape_cast %2 : vector<1x1x12x128xf32> to vector<12x128xf32>
    %4 = arith.maximumf %1, %3 : vector<12x128xf32>
    %5 = tpu.iota {dimensions = array<i32: 0>} : vector<6x12xi32>
    %6 = tpu.iota {dimensions = array<i32: 1>} : vector<6x12xi32>
    %c2_i32 = arith.constant 2 : i32
    %7 = vector.broadcast %c2_i32 : i32 to vector<6x12xi32>
    %8 = arith.muli %7, %5 : vector<6x12xi32>
    %9 = arith.cmpi eq, %6, %8 : vector<6x12xi32>
    %10 = arith.extui %9 : vector<6x12xi1> to vector<6x12xi32>
    %11 = arith.sitofp %10 : vector<6x12xi32> to vector<6x12xf32>
    %c2_i32_6 = arith.constant 2 : i32
    %12 = vector.broadcast %c2_i32_6 : i32 to vector<6x12xi32>
    %13 = arith.muli %12, %5 : vector<6x12xi32>
    %c1_i32 = arith.constant 1 : i32
    %14 = vector.broadcast %c1_i32 : i32 to vector<6x12xi32>
    %15 = arith.addi %13, %14 : vector<6x12xi32>
    %16 = arith.cmpi eq, %6, %15 : vector<6x12xi32>
    %17 = arith.extui %16 : vector<6x12xi1> to vector<6x12xi32>
    %18 = arith.sitofp %17 : vector<6x12xi32> to vector<6x12xf32>
    %cst = arith.constant dense<0.000000e+00> : vector<6x128xf32>
    %19 = tpu.matmul %11, %4, %cst {dimension_numbers = #tpu.dot_dimension_numbers<[1], [0], [0], [1], [0, 0, 1, 1], [], []>} : vector<6x12xf32>, vector<12x128xf32>, vector<6x128xf32> -> vector<6x128xf32>
    %cst_7 = arith.constant dense<0.000000e+00> : vector<6x128xf32>
    %20 = tpu.matmul %18, %4, %cst_7 {dimension_numbers = #tpu.dot_dimension_numbers<[1], [0], [0], [1], [0, 0, 1, 1], [], []>} : vector<6x12xf32>, vector<12x128xf32>, vector<6x128xf32> -> vector<6x128xf32>
    %21 = arith.maximumf %19, %20 : vector<6x128xf32>
    %cst_8 = arith.constant 0.000000e+00 : f32
    %22 = vector.broadcast %cst_8 : f32 to vector<6x128xf32>
    %23 = arith.maximumf %21, %22 : vector<6x128xf32>
    %c0_9 = arith.constant 0 : index
    %c0_10 = arith.constant 0 : index
    %c0_11 = arith.constant 0 : index
    %c0_12 = arith.constant 0 : index
    %24 = vector.load %arg3[%c0_9, %c0_10, %c0_11, %c0_12] : memref<1x1x6x128xf32, #tpu.memory_space<vmem>>, vector<1x1x6x128xf32>
    %25 = vector.shape_cast %24 : vector<1x1x6x128xf32> to vector<6x128xf32>
    %26 = vector.shape_cast %23 : vector<6x128xf32> to vector<1x1x6x128xf32>
    tpu.vector_store %arg3[%c0_9, %c0_10, %c0_11, %c0_12], %26 {strides = array<i32>} : memref<1x1x6x128xf32, #tpu.memory_space<vmem>>, vector<1x1x6x128xf32>,
    return
  }
  func.func @transform_0(%arg0: i32, %arg1: i32) -> (i32, i32, i32, i32) {
    %c0_i32 = arith.constant 0 : i32
    %c0_i32_0 = arith.constant 0 : i32
    %c0_i32_1 = arith.constant 0 : i32
    return %arg0, %arg1, %c0_i32, %c0_i32_0 : i32, i32, i32, i32
  }
  func.func @transform_1(%arg0: i32, %arg1: i32) -> (i32, i32, i32, i32) {
    %c0_i32 = arith.constant 0 : i32
    %c0_i32_0 = arith.constant 0 : i32
    %c0_i32_1 = arith.constant 0 : i32
    return %arg0, %arg1, %c0_i32, %c0_i32_0 : i32, i32, i32, i32
  }
}

module attributes {stable_mosaic.version = 11 : i64} {
  func.func @_matmul_kernel(%arg0: i32, %arg1: i32, %arg2: i32, %arg3: memref<8x384xbf16, #tpu.memory_space<vmem>>, %arg4: memref<384x128xbf16, #tpu.memory_space<vmem>>, %arg5: memref<1x128xf32, #tpu.memory_space<vmem>>, %arg6: memref<8x128xf32, #tpu.memory_space<vmem>>, %arg7: memref<8x128xf32, #tpu.memory_space<vmem>>) attributes {dimension_semantics = [#tpu.dimension_semantics<parallel>, #tpu.dimension_semantics<parallel>, #tpu.dimension_semantics<arbitrary>], iteration_bounds = array<i64: 1, 2, 1>, scalar_prefetch = 0 : i64, scratch_operands = 1 : i64, tpu.core_type = #tpu.core_type<tc>, window_params = [{transform_indices = @transform_0, window_bounds = array<i64: 8, 384>}, {transform_indices = @transform_1, window_bounds = array<i64: 384, 128>}, {transform_indices = @transform_2, window_bounds = array<i64: 1, 128>}, {transform_indices = @transform_3, window_bounds = array<i64: 8, 128>}]} {
    %c0_i32 = arith.constant 0 : i32
    %0 = arith.cmpi eq, %arg2, %c0_i32 : i32
    %1 = arith.extui %0 : i1 to i32
    %c0_i32_0 = arith.constant 0 : i32
    %2 = arith.cmpi ne, %1, %c0_i32_0 : i32
    scf.if %2 {
      %cst_10 = arith.constant 0.000000e+00 : f32
      %12 = vector.broadcast %cst_10 : f32 to vector<8x128xf32>
      %c0_11 = arith.constant 0 : index
      %c0_12 = arith.constant 0 : index
      %13 = vector.load %arg7[%c0_11, %c0_12] : memref<8x128xf32, #tpu.memory_space<vmem>>, vector<8x128xf32>
      tpu.vector_store %arg7[%c0_11, %c0_12], %12 {strides = array<i32>} : memref<8x128xf32, #tpu.memory_space<vmem>>, vector<8x128xf32>,
    } else {
    }
    %c0 = arith.constant 0 : index
    %c0_1 = arith.constant 0 : index
    %3 = vector.load %arg7[%c0, %c0_1] : memref<8x128xf32, #tpu.memory_space<vmem>>, vector<8x128xf32>
    %c0_2 = arith.constant 0 : index
    %c0_3 = arith.constant 0 : index
    %4 = vector.load %arg3[%c0_2, %c0_3] : memref<8x384xbf16, #tpu.memory_space<vmem>>, vector<8x384xbf16>
    %c0_4 = arith.constant 0 : index
    %c0_5 = arith.constant 0 : index
    %5 = vector.load %arg4[%c0_4, %c0_5] : memref<384x128xbf16, #tpu.memory_space<vmem>>, vector<384x128xbf16>
    %cst = arith.constant dense<0.000000e+00> : vector<8x128xf32>
    %6 = tpu.matmul %4, %5, %cst {dimension_numbers = #tpu.dot_dimension_numbers<[1], [0], [0], [1], [0, 0, 1, 1], [], []>} : vector<8x384xbf16>, vector<384x128xbf16>, vector<8x128xf32> -> vector<8x128xf32>
    %7 = arith.addf %3, %6 : vector<8x128xf32>
    %c0_6 = arith.constant 0 : index
    %c0_7 = arith.constant 0 : index
    %8 = vector.load %arg7[%c0_6, %c0_7] : memref<8x128xf32, #tpu.memory_space<vmem>>, vector<8x128xf32>
    tpu.vector_store %arg7[%c0_6, %c0_7], %7 {strides = array<i32>} : memref<8x128xf32, #tpu.memory_space<vmem>>, vector<8x128xf32>,
    %c0_i32_8 = arith.constant 0 : i32
    %9 = arith.cmpi eq, %arg2, %c0_i32_8 : i32
    %10 = arith.extui %9 : i1 to i32
    %c0_i32_9 = arith.constant 0 : i32
    %11 = arith.cmpi ne, %10, %c0_i32_9 : i32
    scf.if %11 {
      %c0_10 = arith.constant 0 : index
      %c0_11 = arith.constant 0 : index
      %12 = vector.load %arg7[%c0_10, %c0_11] : memref<8x128xf32, #tpu.memory_space<vmem>>, vector<8x128xf32>
      %c0_12 = arith.constant 0 : index
      %c0_13 = arith.constant 0 : index
      %13 = vector.load %arg5[%c0_12, %c0_13] : memref<1x128xf32, #tpu.memory_space<vmem>>, vector<1x128xf32>
      %14 = vector.broadcast %13 : vector<1x128xf32> to vector<8x128xf32>
      %15 = arith.addf %12, %14 : vector<8x128xf32>
      %c0_14 = arith.constant 0 : index
      %c0_15 = arith.constant 0 : index
      %16 = vector.load %arg6[%c0_14, %c0_15] : memref<8x128xf32, #tpu.memory_space<vmem>>, vector<8x128xf32>
      tpu.vector_store %arg6[%c0_14, %c0_15], %15 {strides = array<i32>} : memref<8x128xf32, #tpu.memory_space<vmem>>, vector<8x128xf32>,
    } else {
    }
    return
  }
  func.func @transform_0(%arg0: i32, %arg1: i32, %arg2: i32) -> (i32, i32) {
    %c0_i32 = arith.constant 0 : i32
    return %arg0, %arg2 : i32, i32
  }
  func.func @transform_1(%arg0: i32, %arg1: i32, %arg2: i32) -> (i32, i32) {
    %c0_i32 = arith.constant 0 : i32
    return %arg2, %arg1 : i32, i32
  }
  func.func @transform_2(%arg0: i32, %arg1: i32, %arg2: i32) -> (i32, i32) {
    %c0_i32 = arith.constant 0 : i32
    %c0_i32_0 = arith.constant 0 : i32
    return %c0_i32, %arg1 : i32, i32
  }
  func.func @transform_3(%arg0: i32, %arg1: i32, %arg2: i32) -> (i32, i32) {
    %c0_i32 = arith.constant 0 : i32
    return %arg0, %arg1 : i32, i32
  }
}

module attributes {stable_mosaic.version = 11 : i64} {
  func.func @_tail_kernel(%arg0: memref<8x128xf32, #tpu.memory_space<vmem>>, %arg1: memref<5x128x128xf32, #tpu.memory_space<vmem>>, %arg2: memref<5x1x128xf32, #tpu.memory_space<vmem>>, %arg3: memref<128x256xf32, #tpu.memory_space<vmem>>, %arg4: memref<8x256xf32, #tpu.memory_space<vmem>>, %arg5: memref<256x128xf32, #tpu.memory_space<vmem>>, %arg6: memref<1x128xf32, #tpu.memory_space<vmem>>, %arg7: memref<128x128xf32, #tpu.memory_space<vmem>>, %arg8: memref<1x128xf32, #tpu.memory_space<vmem>>, %arg9: memref<8x128xf32, #tpu.memory_space<vmem>>) attributes {dimension_semantics = [], scalar_prefetch = 0 : i64, scratch_operands = 0 : i64, tpu.core_type = #tpu.core_type<tc>} {
    %c0 = arith.constant 0 : index
    %c0_0 = arith.constant 0 : index
    %0 = vector.load %arg0[%c0, %c0_0] : memref<8x128xf32, #tpu.memory_space<vmem>>, vector<8x128xf32>
    %c0_1 = arith.constant 0 : index
    %c0_2 = arith.constant 0 : index
    %c0_3 = arith.constant 0 : index
    %1 = vector.load %arg1[%c0_1, %c0_2, %c0_3] : memref<5x128x128xf32, #tpu.memory_space<vmem>>, vector<1x128x128xf32>
    %2 = vector.shape_cast %1 : vector<1x128x128xf32> to vector<128x128xf32>
    %cst = arith.constant dense<0.000000e+00> : vector<8x128xf32>
    %3 = tpu.matmul %0, %2, %cst {dimension_numbers = #tpu.dot_dimension_numbers<[1], [0], [0], [1], [0, 0, 1, 1], [], []>} : vector<8x128xf32>, vector<128x128xf32>, vector<8x128xf32> -> vector<8x128xf32>
    %c0_4 = arith.constant 0 : index
    %c0_5 = arith.constant 0 : index
    %c0_6 = arith.constant 0 : index
    %4 = vector.load %arg2[%c0_4, %c0_5, %c0_6] : memref<5x1x128xf32, #tpu.memory_space<vmem>>, vector<1x1x128xf32>
    %5 = vector.shape_cast %4 : vector<1x1x128xf32> to vector<1x128xf32>
    %6 = vector.broadcast %5 : vector<1x128xf32> to vector<8x128xf32>
    %7 = arith.addf %3, %6 : vector<8x128xf32>
    %cst_7 = arith.constant 0.000000e+00 : f32
    %8 = vector.broadcast %cst_7 : f32 to vector<8x128xf32>
    %9 = arith.maximumf %7, %8 : vector<8x128xf32>
    %c1 = arith.constant 1 : index
    %c0_8 = arith.constant 0 : index
    %c0_9 = arith.constant 0 : index
    %10 = vector.load %arg1[%c1, %c0_8, %c0_9] : memref<5x128x128xf32, #tpu.memory_space<vmem>>, vector<1x128x128xf32>
    %11 = vector.shape_cast %10 : vector<1x128x128xf32> to vector<128x128xf32>
    %cst_10 = arith.constant dense<0.000000e+00> : vector<8x128xf32>
    %12 = tpu.matmul %9, %11, %cst_10 {dimension_numbers = #tpu.dot_dimension_numbers<[1], [0], [0], [1], [0, 0, 1, 1], [], []>} : vector<8x128xf32>, vector<128x128xf32>, vector<8x128xf32> -> vector<8x128xf32>
    %c1_11 = arith.constant 1 : index
    %c0_12 = arith.constant 0 : index
    %c0_13 = arith.constant 0 : index
    %13 = vector.load %arg2[%c1_11, %c0_12, %c0_13] : memref<5x1x128xf32, #tpu.memory_space<vmem>>, vector<1x1x128xf32>
    %14 = vector.shape_cast %13 : vector<1x1x128xf32> to vector<1x128xf32>
    %15 = vector.broadcast %14 : vector<1x128xf32> to vector<8x128xf32>
    %16 = arith.addf %12, %15 : vector<8x128xf32>
    %cst_14 = arith.constant 0.000000e+00 : f32
    %17 = vector.broadcast %cst_14 : f32 to vector<8x128xf32>
    %18 = arith.maximumf %16, %17 : vector<8x128xf32>
    %c2 = arith.constant 2 : index
    %c0_15 = arith.constant 0 : index
    %c0_16 = arith.constant 0 : index
    %19 = vector.load %arg1[%c2, %c0_15, %c0_16] : memref<5x128x128xf32, #tpu.memory_space<vmem>>, vector<1x128x128xf32>
    %20 = vector.shape_cast %19 : vector<1x128x128xf32> to vector<128x128xf32>
    %cst_17 = arith.constant dense<0.000000e+00> : vector<8x128xf32>
    %21 = tpu.matmul %18, %20, %cst_17 {dimension_numbers = #tpu.dot_dimension_numbers<[1], [0], [0], [1], [0, 0, 1, 1], [], []>} : vector<8x128xf32>, vector<128x128xf32>, vector<8x128xf32> -> vector<8x128xf32>
    %c2_18 = arith.constant 2 : index
    %c0_19 = arith.constant 0 : index
    %c0_20 = arith.constant 0 : index
    %22 = vector.load %arg2[%c2_18, %c0_19, %c0_20] : memref<5x1x128xf32, #tpu.memory_space<vmem>>, vector<1x1x128xf32>
    %23 = vector.shape_cast %22 : vector<1x1x128xf32> to vector<1x128xf32>
    %24 = vector.broadcast %23 : vector<1x128xf32> to vector<8x128xf32>
    %25 = arith.addf %21, %24 : vector<8x128xf32>
    %cst_21 = arith.constant 0.000000e+00 : f32
    %26 = vector.broadcast %cst_21 : f32 to vector<8x128xf32>
    %27 = arith.maximumf %25, %26 : vector<8x128xf32>
    %c3 = arith.constant 3 : index
    %c0_22 = arith.constant 0 : index
    %c0_23 = arith.constant 0 : index
    %28 = vector.load %arg1[%c3, %c0_22, %c0_23] : memref<5x128x128xf32, #tpu.memory_space<vmem>>, vector<1x128x128xf32>
    %29 = vector.shape_cast %28 : vector<1x128x128xf32> to vector<128x128xf32>
    %cst_24 = arith.constant dense<0.000000e+00> : vector<8x128xf32>
    %30 = tpu.matmul %27, %29, %cst_24 {dimension_numbers = #tpu.dot_dimension_numbers<[1], [0], [0], [1], [0, 0, 1, 1], [], []>} : vector<8x128xf32>, vector<128x128xf32>, vector<8x128xf32> -> vector<8x128xf32>
    %c3_25 = arith.constant 3 : index
    %c0_26 = arith.constant 0 : index
    %c0_27 = arith.constant 0 : index
    %31 = vector.load %arg2[%c3_25, %c0_26, %c0_27] : memref<5x1x128xf32, #tpu.memory_space<vmem>>, vector<1x1x128xf32>
    %32 = vector.shape_cast %31 : vector<1x1x128xf32> to vector<1x128xf32>
    %33 = vector.broadcast %32 : vector<1x128xf32> to vector<8x128xf32>
    %34 = arith.addf %30, %33 : vector<8x128xf32>
    %cst_28 = arith.constant 0.000000e+00 : f32
    %35 = vector.broadcast %cst_28 : f32 to vector<8x128xf32>
    %36 = arith.maximumf %34, %35 : vector<8x128xf32>
    %c4 = arith.constant 4 : index
    %c0_29 = arith.constant 0 : index
    %c0_30 = arith.constant 0 : index
    %37 = vector.load %arg1[%c4, %c0_29, %c0_30] : memref<5x128x128xf32, #tpu.memory_space<vmem>>, vector<1x128x128xf32>
    %38 = vector.shape_cast %37 : vector<1x128x128xf32> to vector<128x128xf32>
    %cst_31 = arith.constant dense<0.000000e+00> : vector<8x128xf32>
    %39 = tpu.matmul %36, %38, %cst_31 {dimension_numbers = #tpu.dot_dimension_numbers<[1], [0], [0], [1], [0, 0, 1, 1], [], []>} : vector<8x128xf32>, vector<128x128xf32>, vector<8x128xf32> -> vector<8x128xf32>
    %c4_32 = arith.constant 4 : index
    %c0_33 = arith.constant 0 : index
    %c0_34 = arith.constant 0 : index
    %40 = vector.load %arg2[%c4_32, %c0_33, %c0_34] : memref<5x1x128xf32, #tpu.memory_space<vmem>>, vector<1x1x128xf32>
    %41 = vector.shape_cast %40 : vector<1x1x128xf32> to vector<1x128xf32>
    %42 = vector.broadcast %41 : vector<1x128xf32> to vector<8x128xf32>
    %43 = arith.addf %39, %42 : vector<8x128xf32>
    %cst_35 = arith.constant 0.000000e+00 : f32
    %44 = vector.broadcast %cst_35 : f32 to vector<8x128xf32>
    %45 = arith.maximumf %43, %44 : vector<8x128xf32>
    %c0_36 = arith.constant 0 : index
    %c0_37 = arith.constant 0 : index
    %46 = vector.load %arg4[%c0_36, %c0_37] : memref<8x256xf32, #tpu.memory_space<vmem>>, vector<8x256xf32>
    %c0_38 = arith.constant 0 : index
    %c0_39 = arith.constant 0 : index
    %47 = vector.load %arg3[%c0_38, %c0_39] : memref<128x256xf32, #tpu.memory_space<vmem>>, vector<128x256xf32>
    %cst_40 = arith.constant dense<0.000000e+00> : vector<8x256xf32>
    %48 = tpu.matmul %45, %47, %cst_40 {dimension_numbers = #tpu.dot_dimension_numbers<[1], [0], [0], [1], [0, 0, 1, 1], [], []>} : vector<8x128xf32>, vector<128x256xf32>, vector<8x256xf32> -> vector<8x256xf32>
    %49 = arith.addf %46, %48 : vector<8x256xf32>
    %cst_41 = arith.constant 0.000000e+00 : f32
    %50 = vector.broadcast %cst_41 : f32 to vector<8x256xf32>
    %51 = arith.maximumf %49, %50 : vector<8x256xf32>
    %c0_42 = arith.constant 0 : index
    %c0_43 = arith.constant 0 : index
    %52 = vector.load %arg5[%c0_42, %c0_43] : memref<256x128xf32, #tpu.memory_space<vmem>>, vector<256x128xf32>
    %cst_44 = arith.constant dense<0.000000e+00> : vector<8x128xf32>
    %53 = tpu.matmul %51, %52, %cst_44 {dimension_numbers = #tpu.dot_dimension_numbers<[1], [0], [0], [1], [0, 0, 1, 1], [], []>} : vector<8x256xf32>, vector<256x128xf32>, vector<8x128xf32> -> vector<8x128xf32>
    %c0_45 = arith.constant 0 : index
    %c0_46 = arith.constant 0 : index
    %54 = vector.load %arg6[%c0_45, %c0_46] : memref<1x128xf32, #tpu.memory_space<vmem>>, vector<1x128xf32>
    %55 = vector.broadcast %54 : vector<1x128xf32> to vector<8x128xf32>
    %56 = arith.addf %53, %55 : vector<8x128xf32>
    %cst_47 = arith.constant 0.000000e+00 : f32
    %57 = vector.broadcast %cst_47 : f32 to vector<8x128xf32>
    %58 = arith.maximumf %56, %57 : vector<8x128xf32>
    %c0_48 = arith.constant 0 : index
    %c0_49 = arith.constant 0 : index
    %59 = vector.load %arg7[%c0_48, %c0_49] : memref<128x128xf32, #tpu.memory_space<vmem>>, vector<128x128xf32>
    %cst_50 = arith.constant dense<0.000000e+00> : vector<8x128xf32>
    %60 = tpu.matmul %58, %59, %cst_50 {dimension_numbers = #tpu.dot_dimension_numbers<[1], [0], [0], [1], [0, 0, 1, 1], [], []>} : vector<8x128xf32>, vector<128x128xf32>, vector<8x128xf32> -> vector<8x128xf32>
    %c0_51 = arith.constant 0 : index
    %c0_52 = arith.constant 0 : index
    %61 = vector.load %arg8[%c0_51, %c0_52] : memref<1x128xf32, #tpu.memory_space<vmem>>, vector<1x128xf32>
    %62 = vector.broadcast %61 : vector<1x128xf32> to vector<8x128xf32>
    %63 = arith.addf %60, %62 : vector<8x128xf32>
    %c0_53 = arith.constant 0 : index
    %c0_54 = arith.constant 0 : index
    %64 = vector.load %arg9[%c0_53, %c0_54] : memref<8x128xf32, #tpu.memory_space<vmem>>, vector<8x128xf32>
    tpu.vector_store %arg9[%c0_53, %c0_54], %63 {strides = array<i32>} : memref<8x128xf32, #tpu.memory_space<vmem>>, vector<8x128xf32>,
    return
  }
}

</mosaic_0001>

<bundles_post_ra>
// kernel: cnn_forward.6
= control target key start
LH: loop header
LB: loop body
LE: loop exit
PB: predicated region body
PF: predicated region fallthrough
CT: control target
= control target key end

     0   :  { %s1092_s12 = smov 0   ;;  %s1094_s13 = smov 0   ;;  %s1267_s0 = inlined_call_operand.vmem [shape: bf16[1800,128], index: 0, kind: input, shape index: {}]   ;;  %s1268_s1 = inlined_call_operand.vmem [shape: bf16[128,128], index: 1, kind: input, shape index: {}]   ;;  %s1269_s2 = inlined_call_operand.vmem [shape: f32[1,128], index: 2, kind: input, shape index: {}]   ;;  %s1270_s3 = inlined_call_operand.vmem [shape: f32[1800,128], index: 3, kind: output, shape index: {}]  }
   0x1   :  { %s1096_s14 = smov 0  }
   0x2 LB: > { %s32_s15 = sadd.s32 1, %s1064_s13  ;;  %p867_p0 = scmp.ge.s32.totalorder %s1068_s14, 1  ;;  %s1068_s14 = sphi %s1096_s14, %s13_s14   ;;  %s1064_s13 = sphi %s1094_s13, %s1272_s13   ;;  %s1060_s12 = sphi %s1092_s12, %s1271_s12  }
   0x3   : > { %p34_p1 = scmp.ge.s32.totalorder %s32_s15, 9  ;;  %p188_p2 = scmp.lt.s32.totalorder %s1068_s14, 10 }
   0x5   : > { %s1274_s15 = smov (%p34_p1, %s32_s15), 0  ;;  %p189_p3 = pnand %p867_p0, %p188_p2 }
   0x6   : > { %v1025_v0 = vld [vmem:[%s1268_s1] sm:$0xff] (!%p189_p3)   ;;  %v1070_v1 = vmov (!%p189_p3), 0.0   ;;  %v1026_v2 = vld [vmem:[%s1268_s1 + $0x8] sm:$0xff] (!%p189_p3)   ;;  %s229_s20 = smul.u32 (!%p189_p3), 25, %s1060_s12  ;;  %vm1071_vm0 = vmmov (!%p189_p3), 0   ;;  %v1027_v3 = vld [vmem:[%s1268_s1 + $0x10] sm:$0xff] (!%p189_p3)  }
   0x7   : > { %192 = sbr.rel (%p189_p3) target bundleno = 304 (0x130), region = 32  ;;  %915 = vmatprep.subr.bf16.mxu0 (!%p189_p3), %v1070_v1  ;;  %983 = vmatprep.subr.bf16.mxu1 (!%p189_p3), %v1070_v1  ;;  %v1028_v4 = vld [vmem:[%s1268_s1 + $0x18] sm:$0xff] (!%p189_p3)   ;;  %v1029_v5 = vld [vmem:[%s1268_s1 + $0x20] sm:$0xff] (!%p189_p3)   ;;  %v1030_v6 = vld [vmem:[%s1268_s1 + $0x28] sm:$0xff] (!%p189_p3)  }
   0x8   : > { %916 = vmatpush3.bf16.msra.mxu0 (!%p189_p3), %v1025_v0  ;;  %991 = vmatpush3.bf16.msra.mxu1 (!%p189_p3), %v1025_v0  ;;  %p230_p4 = scmp.lt.s32.totalorder (!%p189_p3), %s229_s20, 224  ;;  %v1031_v7 = vld [vmem:[%s1268_s1 + $0x30] sm:$0xff] (!%p189_p3)   ;;  %v1032_v8 = vld [vmem:[%s1268_s1 + $0x38] sm:$0xff] (!%p189_p3)   ;;  %v1201_v22 = vld [vmem:[%s1269_s2] ss:$0 sm:$0xff] (!%p189_p3) }
   0x9   : > { %917 = vmatprep.subr.bf16.mxu0 (!%p189_p3), %v1070_v1  ;;  %984 = vmatprep.subr.bf16.mxu1 (!%p189_p3), %v1070_v1 }
   0xa   : > { %931 = vmatprep.mubr.msk.bf16.mxu0 (!%p189_p3), %vm1071_vm0, %v1070_v1  ;;  %959 = vmatprep.mubr.msk.bf16.mxu1 (!%p189_p3), %vm1071_vm0, %v1070_v1 }
   0xc   : > { %918 = vmatpush3.bf16.msra.mxu0 (!%p189_p3), %v1026_v2  ;;  %992 = vmatpush3.bf16.msra.mxu1 (!%p189_p3), %v1026_v2 }
   0xd   : > { %919 = vmatprep.subr.bf16.mxu0 (!%p189_p3), %v1070_v1  ;;  %985 = vmatprep.subr.bf16.mxu1 (!%p189_p3), %v1070_v1 }
   0xe   : > { %s1276_s20 = smov (!%p230_p4, %s229_s20), 224 }
   0xf   : > { %s868_s23 = sshll.u32 %s1276_s20, 2  ;;  %s869_s10 = sshll.u32 %s1276_s20, 3 }
  0x10   : > { %s1135_s26 = scalar_lea.vmem %s1267_s0, %s868_s23  ;;  %920 = vmatpush3.bf16.msra.mxu0 %v1027_v3  ;;  %993 = vmatpush3.bf16.msra.mxu1 %v1027_v3  ;;  %s1206_s18 = scalar_lea.vmem %s1270_s3, %s869_s10 }
  0x11   : > { %921 = vmatprep.subr.bf16.mxu0 %v1070_v1  ;;  %986 = vmatprep.subr.bf16.mxu1 %v1070_v1  ;;  %v1033_v9 = vld [vmem:[%s1135_s26] sm:$0xff]   ;;  %v1034_v10 = vld [vmem:[%s1135_s26 + $0x38] sm:$0xff]   ;;  %v1035_v11 = vld [vmem:[%s1135_s26 + $0x8] sm:$0xff]  }
  0x12   : > { %v1036_v12 = vld [vmem:[%s1135_s26 + $0x40] sm:$0xff]   ;;  %v1037_v13 = vld [vmem:[%s1135_s26 + $0x10] sm:$0xff]   ;;  %v1038_v14 = vld [vmem:[%s1135_s26 + $0x48] sm:$0xff]  }
  0x13   : > { %v1039_v15 = vld [vmem:[%s1135_s26 + $0x18] sm:$0xff]   ;;  %v1040_v16 = vld [vmem:[%s1135_s26 + $0x50] sm:$0xff]   ;;  %v1041_v17 = vld [vmem:[%s1135_s26 + $0x20] sm:$0xff]  }
  0x14   : > { %922 = vmatpush3.bf16.msra.mxu0 %v1028_v4  ;;  %994 = vmatpush3.bf16.msra.mxu1 %v1028_v4  ;;  %v1042_v18 = vld [vmem:[%s1135_s26 + $0x58] sm:$0xff]   ;;  %v1043_v19 = vld [vmem:[%s1135_s26 + $0x28] sm:$0xff]   ;;  %v1044_v20 = vld [vmem:[%s1135_s26 + $0x60] ss:$0 sps:$4 sm:$0xff]  }
  0x15   : > { %923 = vmatprep.subr.bf16.mxu0 %v1070_v1  ;;  %987 = vmatprep.subr.bf16.mxu1 %v1070_v1  ;;  %v1045_v21 = vld [vmem:[%s1135_s26 + $0x30] sm:$0xff]  }
  0x18   : > { %924 = vmatpush3.bf16.msra.mxu0 %v1029_v5  ;;  %995 = vmatpush3.bf16.msra.mxu1 %v1029_v5 }
  0x19   : > { %925 = vmatprep.subr.bf16.mxu0 %v1070_v1  ;;  %988 = vmatprep.subr.bf16.mxu1 %v1070_v1 }
  0x1c   : > { %926 = vmatpush3.bf16.msra.mxu0 %v1030_v6  ;;  %996 = vmatpush3.bf16.msra.mxu1 %v1030_v6 }
  0x1d   : > { %927 = vmatprep.subr.bf16.mxu0 %v1070_v1  ;;  %989 = vmatprep.subr.bf16.mxu1 %v1070_v1 }
  0x20   : > { %928 = vmatpush3.bf16.msra.mxu0 %v1031_v7  ;;  %997 = vmatpush3.bf16.msra.mxu1 %v1031_v7 }
  0x21   : > { %929 = vmatprep.subr.bf16.mxu0 %v1070_v1  ;;  %990 = vmatprep.subr.bf16.mxu1 %v1070_v1 }
  0x24   : > { %930 = vmatpush3.bf16.msra.mxu0 %v1032_v8  ;;  %998 = vmatpush3.bf16.msra.mxu1 %v1032_v8 }
  0x27   : > { %932 = vmatmul.mubr.bf16.vlgmr.msra.gmra.mrb[0].mxu0 %v1033_v9  ;;  %960 = vmatmul.mubr.bf16.vlgmr.msra.gmra.mrb[0].mxu1 %v1034_v10 }
  0x28   : > { %935 = vmatprep.mubr.msk.bf16.mxu0 %vm1071_vm0, %v1070_v1  ;;  %963 = vmatprep.mubr.msk.bf16.mxu1 %vm1071_vm0, %v1070_v1 }
  0x2f   : > { %936 = vmatmul.mubr.bf16.gmra.mrb[4].mxu0 %v1035_v11  ;;  %964 = vmatmul.mubr.bf16.gmra.mrb[4].mxu1 %v1036_v12 }
  0x30   : > { %939 = vmatprep.mubr.msk.bf16.mxu0 %vm1071_vm0, %v1070_v1  ;;  %967 = vmatprep.mubr.msk.bf16.mxu1 %vm1071_vm0, %v1070_v1 }
  0x37   : > { %940 = vmatmul.mubr.bf16.gmra.mrb[8].mxu0 %v1037_v13  ;;  %968 = vmatmul.mubr.bf16.gmra.mrb[8].mxu1 %v1038_v14 }
  0x38   : > { %943 = vmatprep.mubr.msk.bf16.mxu0 %vm1071_vm0, %v1070_v1  ;;  %971 = vmatprep.mubr.msk.bf16.mxu1 %vm1071_vm0, %v1070_v1 }
  0x3f   : > { %944 = vmatmul.mubr.bf16.gmra.mrb[12].mxu0 %v1039_v15  ;;  %972 = vmatmul.mubr.bf16.gmra.mrb[12].mxu1 %v1040_v16 }
  0x40   : > { %947 = vmatprep.mubr.msk.bf16.mxu0 %vm1071_vm0, %v1070_v1  ;;  %975 = vmatprep.mubr.msk.bf16.mxu1 %vm1071_vm0, %v1070_v1 }
  0x47   : > { %948 = vmatmul.mubr.bf16.gmra.mrb[16].mxu0 %v1041_v17  ;;  %976 = vmatmul.mubr.bf16.gmra.mrb[16].mxu1 %v1042_v18 }
  0x48   : > { %951 = vmatprep.mubr.msk.bf16.mxu0 %vm1071_vm0, %v1070_v1  ;;  %979 = vmatprep.mubr.msk.bf16.mxu1 %vm1071_vm0, %v1070_v1 }
  0x4f   : > { %952 = vmatmul.mubr.bf16.gmra.mrb[20].mxu0 %v1043_v19  ;;  %980 = vmatmul.mubr.bf16.gmra.mrb[20].mxu1 %v1044_v20 }
  0x50   : > { %955 = vmatprep.mubr.msk.bf16.mxu0 %vm1071_vm0, %v1070_v1 }
  0x57   : > { %956 = vmatmul.mubr.bf16.gmra.mrb[24].mxu0 %v1045_v21 }
  0xfa   : > { %v513_v23 = vpop.f32.mrb[0].mxu0  ;;  %v569_v24 = vpop.f32.mrb[0].mxu1 }
  0xfb   : > { %v700_v25 = vadd.f32 %v1201_v22, %v513_v23  ;;  %v933_v26 = vpop.f32.mrb[1].mxu0  ;;  %v714_v27 = vadd.f32 %v1201_v22, %v569_v24  ;;  %v961_v28 = vpop.f32.mrb[1].mxu1 }
  0xfc   : > { %v516_v29 = vpop.f32.mrb[2].mxu0  ;;  %v572_v30 = vpop.f32.mrb[2].mxu1 }
  0xfd   : > { %725 = vst [vmem:[%s1206_s18] sm:$0xff] %v700_v25  ;;  %v701_v31 = vadd.f32 %v1201_v22, %v516_v29  ;;  %v934_v32 = vpop.f32.mrb[3].mxu0  ;;  %739 = vst [vmem:[%s1206_s18 + $0x70] sm:$0xff] %v714_v27  ;;  %v715_v33 = vadd.f32 %v1201_v22, %v572_v30  ;;  %v962_v34 = vpop.f32.mrb[3].mxu1 }
  0xff   : > { %726 = vst [vmem:[%s1206_s18 + $0x8] sm:$0xff] %v701_v31  ;;  %740 = vst [vmem:[%s1206_s18 + $0x78] sm:$0xff] %v715_v33 }
 0x102   : > { %v521_v35 = vpop.f32.mrb[4].mxu0  ;;  %v577_v36 = vpop.f32.mrb[4].mxu1 }
 0x103   : > { %v702_v37 = vadd.f32 %v1201_v22, %v521_v35  ;;  %v937_v38 = vpop.f32.mrb[5].mxu0  ;;  %v716_v39 = vadd.f32 %v1201_v22, %v577_v36  ;;  %v965_v40 = vpop.f32.mrb[5].mxu1 }
 0x104   : > { %v524_v41 = vpop.f32.mrb[6].mxu0  ;;  %v580_v42 = vpop.f32.mrb[6].mxu1 }
 0x105   : > { %727 = vst [vmem:[%s1206_s18 + $0x10] sm:$0xff] %v702_v37  ;;  %v703_v43 = vadd.f32 %v1201_v22, %v524_v41  ;;  %v938_v44 = vpop.f32.mrb[7].mxu0  ;;  %741 = vst [vmem:[%s1206_s18 + $0x80] sm:$0xff] %v716_v39  ;;  %v717_v45 = vadd.f32 %v1201_v22, %v580_v42  ;;  %v966_v46 = vpop.f32.mrb[7].mxu1 }
 0x107   : > { %728 = vst [vmem:[%s1206_s18 + $0x18] sm:$0xff] %v703_v43  ;;  %742 = vst [vmem:[%s1206_s18 + $0x88] sm:$0xff] %v717_v45 }
 0x10a   : > { %v529_v47 = vpop.f32.mrb[8].mxu0  ;;  %v585_v48 = vpop.f32.mrb[8].mxu1 }
 0x10b   : > { %v704_v49 = vadd.f32 %v1201_v22, %v529_v47  ;;  %v941_v50 = vpop.f32.mrb[9].mxu0  ;;  %v718_v51 = vadd.f32 %v1201_v22, %v585_v48  ;;  %v969_v52 = vpop.f32.mrb[9].mxu1 }
 0x10c   : > { %v532_v53 = vpop.f32.mrb[10].mxu0  ;;  %v588_v54 = vpop.f32.mrb[10].mxu1 }
 0x10d   : > { %729 = vst [vmem:[%s1206_s18 + $0x20] sm:$0xff] %v704_v49  ;;  %v705_v55 = vadd.f32 %v1201_v22, %v532_v53  ;;  %v942_v56 = vpop.f32.mrb[11].mxu0  ;;  %743 = vst [vmem:[%s1206_s18 + $0x90] sm:$0xff] %v718_v51  ;;  %v719_v57 = vadd.f32 %v1201_v22, %v588_v54  ;;  %v970_v58 = vpop.f32.mrb[11].mxu1 }
 0x10f   : > { %730 = vst [vmem:[%s1206_s18 + $0x28] sm:$0xff] %v705_v55  ;;  %744 = vst [vmem:[%s1206_s18 + $0x98] sm:$0xff] %v719_v57 }
 0x112   : > { %v537_v59 = vpop.f32.mrb[12].mxu0  ;;  %v593_v60 = vpop.f32.mrb[12].mxu1 }
 0x113   : > { %v706_v61 = vadd.f32 %v1201_v22, %v537_v59  ;;  %v945_v62 = vpop.f32.mrb[13].mxu0  ;;  %v720_v63 = vadd.f32 %v1201_v22, %v593_v60  ;;  %v973_v0 = vpop.f32.mrb[13].mxu1 }
 0x114   : > { %v540_v1 = vpop.f32.mrb[14].mxu0  ;;  %v596_v2 = vpop.f32.mrb[14].mxu1 }
 0x115   : > { %731 = vst [vmem:[%s1206_s18 + $0x30] sm:$0xff] %v706_v61  ;;  %v707_v3 = vadd.f32 %v1201_v22, %v540_v1  ;;  %v946_v4 = vpop.f32.mrb[15].mxu0  ;;  %745 = vst [vmem:[%s1206_s18 + $0xa0] sm:$0xff] %v720_v63  ;;  %v721_v5 = vadd.f32 %v1201_v22, %v596_v2  ;;  %v974_v6 = vpop.f32.mrb[15].mxu1 }
 0x117   : > { %732 = vst [vmem:[%s1206_s18 + $0x38] sm:$0xff] %v707_v3  ;;  %746 = vst [vmem:[%s1206_s18 + $0xa8] sm:$0xff] %v721_v5 }
 0x11a   : > { %v545_v7 = vpop.f32.mrb[16].mxu0  ;;  %v601_v8 = vpop.f32.mrb[16].mxu1 }
 0x11b   : > { %v708_v9 = vadd.f32 %v1201_v22, %v545_v7  ;;  %v949_v10 = vpop.f32.mrb[17].mxu0  ;;  %v722_v11 = vadd.f32 %v1201_v22, %v601_v8  ;;  %v977_v12 = vpop.f32.mrb[17].mxu1 }
 0x11c   : > { %v548_v13 = vpop.f32.mrb[18].mxu0  ;;  %v604_v14 = vpop.f32.mrb[18].mxu1 }
 0x11d   : > { %733 = vst [vmem:[%s1206_s18 + $0x40] sm:$0xff] %v708_v9  ;;  %v709_v15 = vadd.f32 %v1201_v22, %v548_v13  ;;  %v950_v16 = vpop.f32.mrb[19].mxu0  ;;  %747 = vst [vmem:[%s1206_s18 + $0xb0] sm:$0xff] %v722_v11  ;;  %v723_v17 = vadd.f32 %v1201_v22, %v604_v14  ;;  %v978_v18 = vpop.f32.mrb[19].mxu1 }
 0x11f   : > { %734 = vst [vmem:[%s1206_s18 + $0x48] sm:$0xff] %v709_v15  ;;  %748 = vst [vmem:[%s1206_s18 + $0xb8] sm:$0xff] %v723_v17 }
 0x122   : > { %v553_v19 = vpop.f32.mrb[20].mxu0  ;;  %v609_v20 = vpop.f32.mrb[20].mxu1 }
 0x123   : > { %v710_v21 = vadd.f32 %v1201_v22, %v553_v19  ;;  %v953_v23 = vpop.f32.mrb[21].mxu0  ;;  %v724_v24 = vadd.f32 %v1201_v22, %v609_v20  ;;  %v981_v25 = vpop.f32.mrb[21].mxu1 }
 0x124   : > { %v556_v26 = vpop.f32.mrb[22].mxu0  ;;  %v612_v27 = vpop.f32.mrb[22].mxu1 }
 0x125   : > { %735 = vst [vmem:[%s1206_s18 + $0x50] sm:$0xff] %v710_v21  ;;  %v711_v28 = vadd.f32 %v1201_v22, %v556_v26  ;;  %v954_v29 = vpop.f32.mrb[23].mxu0  ;;  %749 = vst [vmem:[%s1206_s18 + $0xc0] sm:$0xff] %v724_v24  ;;  %v982_v30 = vpop.f32.mrb[23].mxu1 }
 0x127   : > { %736 = vst [vmem:[%s1206_s18 + $0x58] sm:$0xff] %v711_v28 }
 0x12a   : > { %v561_v31 = vpop.f32.mrb[24].mxu0 }
 0x12b   : > { %v712_v32 = vadd.f32 %v1201_v22, %v561_v31  ;;  %v957_v33 = vpop.f32.mrb[25].mxu0 }
 0x12c   : > { %v564_v34 = vpop.f32.mrb[26].mxu0 }
 0x12d   : > { %737 = vst [vmem:[%s1206_s18 + $0x60] sm:$0xff] %v712_v32  ;;  %v713_v35 = vadd.f32 %v1201_v22, %v564_v34  ;;  %v958_v36 = vpop.f32.mrb[27].mxu0 }
 0x12f   : > { %738 = vst [vmem:[%s1206_s18 + $0x68] sm:$0xff] %v713_v35 }
 0x130 PF: > { %s13_s14 = sadd.s32 1, %s1068_s14   ;;  %s1271_s12 = smov %s1064_s13 }
 0x131   : > { %p10_p5 = scmp.ge.s32.totalorder %s13_s14, 11   ;;  %s1272_s13 = smov %s1274_s15 }
 0x133   :  { %12 = sbr.rel (!%p10_p5) target bundleno = 2 (0x2), region = 76 }

// kernel: cnn_forward.7
= control target key start
LH: loop header
LB: loop body
LE: loop exit
PB: predicated region body
PF: predicated region fallthrough
CT: control target
= control target key end

     0   :  { %s636_s6 = smov 0   ;;  %s638_s7 = smov 0   ;;  %s700_s0 = inlined_call_operand.vmem [shape: f32[2,30,30,128], index: 0, kind: input, shape index: {}]   ;;  %s701_s1 = inlined_call_operand.vmem [shape: f32[2,15,15,128], index: 1, kind: output, shape index: {}]  }
   0x1   :  { %s640_s8 = smov 0   ;;  %s642_s9 = smov 0  }
   0x2   :  { %s644_s10 = smov 0  }
   0x3 LB: > { %s20_s11 = sadd.s32 1, %s614_s8  ;;  %s23_s12 = sadd.s32 1, %s618_s9  ;;  %s622_s10 = sphi %s644_s10, %s11_s10   ;;  %s618_s9 = sphi %s642_s9, %s705_s9   ;;  %s614_s8 = sphi %s640_s8, %s704_s8   ;;  %s610_s7 = sphi %s638_s7, %s703_s7   ;;  %s606_s6 = sphi %s636_s6, %s702_s6  }
   0x4   : > { %p21_p0 = scmp.ge.s32.totalorder %s20_s11, 15  ;;  %p464_p1 = scmp.ge.s32.totalorder %s622_s10, 1 }
   0x5   : > { %p109_p2 = scmp.lt.s32.totalorder %s622_s10, 31 }
   0x6   : > { %s707_s11 = smov (%p21_p0, %s20_s11), 0  ;;  %s709_s12 = smov (!%p21_p0, %s23_s12), %s618_s9 }
   0x7   : > { %p110_p3 = pnand %p464_p1, %p109_p2  ;;  %p25_p4 = scmp.ge.s32.totalorder %s709_s12, 2 }
   0x8   : > { %s465_s13 = sshll.u32 (!%p110_p3), %s606_s6, 1  ;;  %p139_p5 = scmp.lt.s32.totalorder (!%p110_p3), %s610_s7, 1  ;;  %v171_v0 = vlaneseq (!%p110_p3)  ;;  %vm192_vm0 = vcmask (!%p110_p3), 244736   ;;  %v624_v6 = vmov (!%p110_p3), 0.0   ;;  %vm199_vm3 = vcmask (!%p110_p3), 1045504  }
   0x9   : > { %s711_s12 = smov (%p25_p4, %s709_s12), 0  ;;  %113 = sbr.rel (%p110_p3) target bundleno = 254 (0xfe), region = 24 }
   0xa   : > { %p141_p6 = scmp.lt.s32.totalorder (!%p110_p3), %s465_s13, 29  ;;  %v172_v1 = vshrl.u32 (!%p110_p3), %v171_v0, 7  ;;  %v175_v2 = vand.u32 (!%p110_p3), 127, %v171_v0  ;;  %vm625_vm4 = vmmov (!%p110_p3), 1   ;;  %p151_p7 = scmp.lt.s32.totalorder (!%p110_p3), %s606_s6, 14 }
   0xb   : > { %vm525_vm5 = vmpackc.low (!%p110_p3), %vm199_vm3, %vm625_vm4 }
   0xc   : > { %v176_v3 = vmul.u32 (!%p110_p3), 2, %v172_v1  ;;  %v173_v4 = vadd.s32 (!%p110_p3), 8, %v172_v1 }
   0xe   : > { %vm178_vm1 = vcmp.eq.s32.totalorder (!%p110_p3), %v175_v2, %v176_v3  ;;  %v184_v5 = vadd.s32 (!%p110_p3), 1, %v176_v3  ;;  %v177_v12 = vmul.u32 (!%p110_p3), 2, %v173_v4 }
   0xf   : > { %v474_v7 = vsel (!%p110_p3), %vm178_vm1, 1.0, %v624_v6 }
  0x10   : > { %s713_s7 = smov (!%p139_p5, %s610_s7), 1  ;;  %s715_s13 = smov (!%p141_p6, %s465_s13), 29  ;;  %506 = vmatprep.mubr.msk.f32.mxu0 %vm192_vm0, %v474_v7  ;;  %vm186_vm2 = vcmp.eq.s32.totalorder %v175_v2, %v184_v5  ;;  %v185_v23 = vadd.s32 1, %v177_v12  ;;  %vm179_vm6 = vcmp.eq.s32.totalorder %v175_v2, %v177_v12 }
  0x11   : > { %s540_s14 = smul.u32 120, %s713_s7  ;;  %s466_s15 = sshll.u32 %s715_s13, 2  ;;  %v476_v11 = vsel %vm186_vm2, 1.0, %v624_v6  ;;  %v475_v25 = vsel %vm179_vm6, 1.0, %v624_v6 }
  0x12   : > { %517 = vmatprep.mubr.msk.f32.mxu1 %vm192_vm0, %v476_v11  ;;  %vm187_vm7 = vcmp.eq.s32.totalorder %v175_v2, %v185_v23  ;;  %s717_s6 = smov (!%p151_p7, %s606_s6), 14  ;;  %s541_s21 = smul.u32 30, %s713_s7 }
  0x13   : > { %s145_s16 = sadd.s32 %s540_s14, %s466_s15  ;;  %v477_v26 = vsel %vm187_vm7, 1.0, %v624_v6  ;;  %s468_s22 = sshll.u32 %s717_s6, 1 }
  0x14   : > { %s467_s17 = sshll.u32 %s145_s16, 3  ;;  %s155_s23 = sadd.s32 %s541_s21, %s468_s22 }
  0x15   : > { %s147_s20 = scalar_lea.vmem %s700_s0, %s467_s17  ;;  %s469_s24 = sshll.u32 %s155_s23, 3 }
  0x16   : > { %v158_v8 = vld [vmem:[%s147_s20] sm:$0xff]  ;;  %v159_v9 = vld [vmem:[%s147_s20 + $0x8] sm:$0xff]  ;;  %v160_v15 = vld [vmem:[%s147_s20 + $0x10] sm:$0xff]  ;;  %s157_s27 = scalar_lea.vmem %s701_s1, %s469_s24 }
  0x17   : > { %v470_v10 = vld [vmem:[%s147_s20 + $0x20] sm:$0xff]  ;;  %v471_v13 = vld [vmem:[%s147_s20 + $0x28] sm:$0xff]  ;;  %v161_v16 = vld [vmem:[%s147_s20 + $0x18] sm:$0x3f] }
  0x18   : > { %v167_v14 = vmax.f32 %v158_v8, %v470_v10  ;;  %v168_v17 = vmax.f32 %v159_v9, %v471_v13  ;;  %v472_v18 = vld [vmem:[%s147_s20 + $0x30] sm:$0xff]  ;;  %v473_v19 = vld [vmem:[%s147_s20 + $0x38] sm:$0x3f] }
  0x19   : > { %v169_v20 = vmax.f32 %v160_v15, %v472_v18  ;;  %v170_v21 = vmax.f32 %v161_v16, %v473_v19 }
  0x1a   : > { %v520_v22 = vpack.c.bf16 %v168_v17, %v167_v14 }
  0x1b   : > { %v524_v24 = vpack.c.bf16 %v170_v21, %v169_v20 }
  0x1c   : > { %521 = vmatprep.subr.bf16.mxu0 %v520_v22  ;;  %531 = vmatprep.subr.bf16.mxu1 %v520_v22 }
  0x1d   : > { %523 = vmatpush3.bf16.msra.mxu0 %v520_v22  ;;  %533 = vmatpush3.bf16.msra.mxu1 %v520_v22 }
  0x1e   : > { %526 = vmatprep.subr.msk.bf16.mxu0 %vm525_vm5, %v524_v24  ;;  %536 = vmatprep.subr.msk.bf16.mxu1 %vm525_vm5, %v524_v24 }
  0x21   : > { %529 = vmatpush3.bf16.msk.msra.mxu0 %vm525_vm5, %v524_v24  ;;  %539 = vmatpush3.bf16.msk.msra.mxu1 %vm525_vm5, %v524_v24 }
  0x24   : > { %507 = vmatmul.mubr.msk.f32.vlgmr.msra.gmra.mrb[0].mxu0 %vm192_vm0, %v475_v25  ;;  %518 = vmatmul.mubr.msk.f32.vlgmr.msra.gmra.mrb[0].mxu1 %vm192_vm0, %v477_v26 }
  0xf7   : > { %v508_v27 = vpop.f32.mrb[0].mxu0  ;;  %v519_v28 = vpop.f32.mrb[0].mxu1 }
  0xf8   : > { %v360_v29 = vmax.f32 %v508_v27, %v519_v28  ;;  %v269_v30 = vpop.f32.mrb[1].mxu0  ;;  %v350_v31 = vpop.f32.mrb[1].mxu1 }
  0xf9   : > { %v359_v32 = vmax.f32 %v269_v30, %v350_v31 }
  0xfa   : > { %v362_v33 = vmax.f32 %v360_v29, 0.0 }
  0xfb   : > { %v361_v34 = vmax.f32 %v359_v32, 0.0 }
  0xfc   : > { %364 = vst [vmem:[%s157_s27 + $0x8] sm:$0x7f] %v362_v33 }
  0xfd   : > { %363 = vst [vmem:[%s157_s27] sm:$0xff] %v361_v34 }
  0xfe PF: > { %s11_s10 = sadd.s32 1, %s622_s10   ;;  %s702_s6 = smov %s614_s8 }
  0xff   : > { %p8_p8 = scmp.ge.s32.totalorder %s11_s10, 32   ;;  %s703_s7 = smov %s618_s9 }
 0x100   : > { %s704_s8 = smov %s707_s11  ;;  %s705_s9 = smov %s711_s12 }
 0x101   :  { %10 = sbr.rel (!%p8_p8) target bundleno = 3 (0x3), region = 55 }

// kernel: cnn_forward.8
= control target key start
LH: loop header
LB: loop body
LE: loop exit
PB: predicated region body
PF: predicated region fallthrough
CT: control target
= control target key end

     0   :  { %s955_s12 = smov 0   ;;  %s957_s13 = smov 0   ;;  %s1104_s0 = inlined_call_operand.vmem [shape: bf16[288,128], index: 0, kind: input, shape index: {}]   ;;  %s1105_s1 = inlined_call_operand.vmem [shape: bf16[128,128], index: 1, kind: input, shape index: {}]   ;;  %s1106_s2 = inlined_call_operand.vmem [shape: f32[1,128], index: 2, kind: input, shape index: {}]   ;;  %s1107_s3 = inlined_call_operand.vmem [shape: f32[288,128], index: 3, kind: output, shape index: {}]  }
   0x1   :  { %s959_s14 = smov 0  }
   0x2 LB: > { %s32_s15 = sadd.s32 1, %s927_s13  ;;  %p758_p0 = scmp.ge.s32.totalorder %s931_s14, 1  ;;  %s931_s14 = sphi %s959_s14, %s13_s14   ;;  %s927_s13 = sphi %s957_s13, %s1109_s13   ;;  %s923_s12 = sphi %s955_s12, %s1108_s12  }
   0x3   : > { %p34_p1 = scmp.ge.s32.totalorder %s32_s15, 2  ;;  %p188_p2 = scmp.lt.s32.totalorder %s931_s14, 3 }
   0x5   : > { %s1111_s15 = smov (%p34_p1, %s32_s15), 0  ;;  %p189_p3 = pnand %p758_p0, %p188_p2 }
   0x6   : > { %v892_v0 = vld [vmem:[%s1105_s1] sm:$0xff] (!%p189_p3)   ;;  %v933_v1 = vmov (!%p189_p3), 0.0   ;;  %v893_v2 = vld [vmem:[%s1105_s1 + $0x8] sm:$0xff] (!%p189_p3)   ;;  %s229_s20 = smul.u32 (!%p189_p3), 18, %s923_s12  ;;  %vm934_vm0 = vmmov (!%p189_p3), 0   ;;  %v894_v3 = vld [vmem:[%s1105_s1 + $0x10] sm:$0xff] (!%p189_p3)  }
   0x7   : > { %192 = sbr.rel (%p189_p3) target bundleno = 288 (0x120), region = 32  ;;  %798 = vmatprep.subr.bf16.mxu0 (!%p189_p3), %v933_v1  ;;  %850 = vmatprep.subr.bf16.mxu1 (!%p189_p3), %v933_v1  ;;  %v895_v4 = vld [vmem:[%s1105_s1 + $0x18] sm:$0xff] (!%p189_p3)   ;;  %v896_v5 = vld [vmem:[%s1105_s1 + $0x20] sm:$0xff] (!%p189_p3)   ;;  %v897_v6 = vld [vmem:[%s1105_s1 + $0x28] sm:$0xff] (!%p189_p3)  }
   0x8   : > { %799 = vmatpush3.bf16.msra.mxu0 (!%p189_p3), %v892_v0  ;;  %858 = vmatpush3.bf16.msra.mxu1 (!%p189_p3), %v892_v0  ;;  %p230_p4 = scmp.lt.s32.totalorder (!%p189_p3), %s229_s20, 35  ;;  %v898_v7 = vld [vmem:[%s1105_s1 + $0x30] sm:$0xff] (!%p189_p3)   ;;  %v899_v8 = vld [vmem:[%s1105_s1 + $0x38] sm:$0xff] (!%p189_p3)   ;;  %v1052_v18 = vld [vmem:[%s1106_s2] ss:$0 sm:$0xff] (!%p189_p3) }
   0x9   : > { %800 = vmatprep.subr.bf16.mxu0 (!%p189_p3), %v933_v1  ;;  %851 = vmatprep.subr.bf16.mxu1 (!%p189_p3), %v933_v1 }
   0xa   : > { %814 = vmatprep.mubr.msk.bf16.mxu0 (!%p189_p3), %vm934_vm0, %v933_v1  ;;  %834 = vmatprep.mubr.msk.bf16.mxu1 (!%p189_p3), %vm934_vm0, %v933_v1 }
   0xc   : > { %801 = vmatpush3.bf16.msra.mxu0 (!%p189_p3), %v893_v2  ;;  %859 = vmatpush3.bf16.msra.mxu1 (!%p189_p3), %v893_v2 }
   0xd   : > { %802 = vmatprep.subr.bf16.mxu0 (!%p189_p3), %v933_v1  ;;  %852 = vmatprep.subr.bf16.mxu1 (!%p189_p3), %v933_v1 }
   0xe   : > { %s1113_s20 = smov (!%p230_p4, %s229_s20), 35 }
   0xf   : > { %s759_s23 = sshll.u32 %s1113_s20, 2  ;;  %s760_s10 = sshll.u32 %s1113_s20, 3 }
  0x10   : > { %s998_s26 = scalar_lea.vmem %s1104_s0, %s759_s23  ;;  %803 = vmatpush3.bf16.msra.mxu0 %v894_v3  ;;  %860 = vmatpush3.bf16.msra.mxu1 %v894_v3  ;;  %s1057_s18 = scalar_lea.vmem %s1107_s3, %s760_s10 }
  0x11   : > { %804 = vmatprep.subr.bf16.mxu0 %v933_v1  ;;  %853 = vmatprep.subr.bf16.mxu1 %v933_v1  ;;  %v900_v9 = vld [vmem:[%s998_s26] sm:$0xff]   ;;  %v901_v10 = vld [vmem:[%s998_s26 + $0x28] sm:$0xff]   ;;  %v903_v12 = vld [vmem:[%s998_s26 + $0x30] sm:$0xff]  }
  0x12   : > { %v902_v11 = vld [vmem:[%s998_s26 + $0x8] sm:$0xff]   ;;  %v904_v13 = vld [vmem:[%s998_s26 + $0x10] sm:$0xff]   ;;  %v905_v14 = vld [vmem:[%s998_s26 + $0x38] sm:$0xff]  }
  0x13   : > { %v906_v15 = vld [vmem:[%s998_s26 + $0x18] sm:$0xff]   ;;  %v907_v16 = vld [vmem:[%s998_s26 + $0x40] sm:$0xff]  }
  0x14   : > { %805 = vmatpush3.bf16.msra.mxu0 %v895_v4  ;;  %861 = vmatpush3.bf16.msra.mxu1 %v895_v4  ;;  %v908_v17 = vld [vmem:[%s998_s26 + $0x20] sm:$0xff]  }
  0x15   : > { %806 = vmatprep.subr.bf16.mxu0 %v933_v1  ;;  %854 = vmatprep.subr.bf16.mxu1 %v933_v1 }
  0x18   : > { %807 = vmatpush3.bf16.msra.mxu0 %v896_v5  ;;  %862 = vmatpush3.bf16.msra.mxu1 %v896_v5 }
  0x19   : > { %808 = vmatprep.subr.bf16.mxu0 %v933_v1  ;;  %855 = vmatprep.subr.bf16.mxu1 %v933_v1 }
  0x1c   : > { %809 = vmatpush3.bf16.msra.mxu0 %v897_v6  ;;  %863 = vmatpush3.bf16.msra.mxu1 %v897_v6 }
  0x1d   : > { %810 = vmatprep.subr.bf16.mxu0 %v933_v1  ;;  %856 = vmatprep.subr.bf16.mxu1 %v933_v1 }
  0x20   : > { %811 = vmatpush3.bf16.msra.mxu0 %v898_v7  ;;  %864 = vmatpush3.bf16.msra.mxu1 %v898_v7 }
  0x21   : > { %812 = vmatprep.subr.bf16.mxu0 %v933_v1  ;;  %857 = vmatprep.subr.bf16.mxu1 %v933_v1 }
  0x24   : > { %813 = vmatpush3.bf16.msra.mxu0 %v899_v8  ;;  %865 = vmatpush3.bf16.msra.mxu1 %v899_v8 }
  0x27   : > { %815 = vmatmul.mubr.bf16.vlgmr.msra.gmra.mrb[0].mxu0 %v900_v9  ;;  %835 = vmatmul.mubr.bf16.vlgmr.msra.gmra.mrb[0].mxu1 %v901_v10 }
  0x28   : > { %818 = vmatprep.mubr.msk.bf16.mxu0 %vm934_vm0, %v933_v1  ;;  %838 = vmatprep.mubr.msk.bf16.mxu1 %vm934_vm0, %v933_v1 }
  0x2f   : > { %819 = vmatmul.mubr.bf16.gmra.mrb[4].mxu0 %v902_v11  ;;  %839 = vmatmul.mubr.bf16.gmra.mrb[4].mxu1 %v903_v12 }
  0x30   : > { %822 = vmatprep.mubr.msk.bf16.mxu0 %vm934_vm0, %v933_v1  ;;  %842 = vmatprep.mubr.msk.bf16.mxu1 %vm934_vm0, %v933_v1 }
  0x37   : > { %823 = vmatmul.mubr.bf16.gmra.mrb[8].mxu0 %v904_v13  ;;  %843 = vmatmul.mubr.bf16.gmra.mrb[8].mxu1 %v905_v14 }
  0x38   : > { %826 = vmatprep.mubr.msk.bf16.mxu0 %vm934_vm0, %v933_v1  ;;  %846 = vmatprep.mubr.msk.bf16.mxu1 %vm934_vm0, %v933_v1 }
  0x3f   : > { %827 = vmatmul.mubr.bf16.gmra.mrb[12].mxu0 %v906_v15  ;;  %847 = vmatmul.mubr.bf16.gmra.mrb[12].mxu1 %v907_v16 }
  0x40   : > { %830 = vmatprep.mubr.msk.bf16.mxu0 %vm934_vm0, %v933_v1 }
  0x47   : > { %831 = vmatmul.mubr.bf16.gmra.mrb[16].mxu0 %v908_v17 }
  0xfa   : > { %v470_v19 = vpop.f32.mrb[0].mxu0  ;;  %v510_v20 = vpop.f32.mrb[0].mxu1 }
  0xfb   : > { %v605_v21 = vadd.f32 %v1052_v18, %v470_v19  ;;  %v816_v22 = vpop.f32.mrb[1].mxu0  ;;  %v615_v23 = vadd.f32 %v1052_v18, %v510_v20  ;;  %v836_v24 = vpop.f32.mrb[1].mxu1 }
  0xfc   : > { %v473_v25 = vpop.f32.mrb[2].mxu0  ;;  %v513_v26 = vpop.f32.mrb[2].mxu1 }
  0xfd   : > { %623 = vst [vmem:[%s1057_s18] sm:$0xff] %v605_v21  ;;  %v606_v27 = vadd.f32 %v1052_v18, %v473_v25  ;;  %v817_v28 = vpop.f32.mrb[3].mxu0  ;;  %633 = vst [vmem:[%s1057_s18 + $0x50] sm:$0xff] %v615_v23  ;;  %v616_v29 = vadd.f32 %v1052_v18, %v513_v26  ;;  %v837_v30 = vpop.f32.mrb[3].mxu1 }
  0xff   : > { %624 = vst [vmem:[%s1057_s18 + $0x8] sm:$0xff] %v606_v27  ;;  %634 = vst [vmem:[%s1057_s18 + $0x58] sm:$0xff] %v616_v29 }
 0x102   : > { %v478_v31 = vpop.f32.mrb[4].mxu0  ;;  %v518_v32 = vpop.f32.mrb[4].mxu1 }
 0x103   : > { %v607_v33 = vadd.f32 %v1052_v18, %v478_v31  ;;  %v820_v34 = vpop.f32.mrb[5].mxu0  ;;  %v617_v35 = vadd.f32 %v1052_v18, %v518_v32  ;;  %v840_v36 = vpop.f32.mrb[5].mxu1 }
 0x104   : > { %v481_v37 = vpop.f32.mrb[6].mxu0  ;;  %v521_v38 = vpop.f32.mrb[6].mxu1 }
 0x105   : > { %625 = vst [vmem:[%s1057_s18 + $0x10] sm:$0xff] %v607_v33  ;;  %v608_v39 = vadd.f32 %v1052_v18, %v481_v37  ;;  %v821_v40 = vpop.f32.mrb[7].mxu0  ;;  %635 = vst [vmem:[%s1057_s18 + $0x60] sm:$0xff] %v617_v35  ;;  %v618_v41 = vadd.f32 %v1052_v18, %v521_v38  ;;  %v841_v42 = vpop.f32.mrb[7].mxu1 }
 0x107   : > { %626 = vst [vmem:[%s1057_s18 + $0x18] sm:$0xff] %v608_v39  ;;  %636 = vst [vmem:[%s1057_s18 + $0x68] sm:$0xff] %v618_v41 }
 0x10a   : > { %v486_v43 = vpop.f32.mrb[8].mxu0  ;;  %v526_v44 = vpop.f32.mrb[8].mxu1 }
 0x10b   : > { %v609_v45 = vadd.f32 %v1052_v18, %v486_v43  ;;  %v824_v46 = vpop.f32.mrb[9].mxu0  ;;  %v619_v47 = vadd.f32 %v1052_v18, %v526_v44  ;;  %v844_v48 = vpop.f32.mrb[9].mxu1 }
 0x10c   : > { %v489_v49 = vpop.f32.mrb[10].mxu0  ;;  %v529_v50 = vpop.f32.mrb[10].mxu1 }
 0x10d   : > { %627 = vst [vmem:[%s1057_s18 + $0x20] sm:$0xff] %v609_v45  ;;  %v610_v51 = vadd.f32 %v1052_v18, %v489_v49  ;;  %v825_v52 = vpop.f32.mrb[11].mxu0  ;;  %637 = vst [vmem:[%s1057_s18 + $0x70] sm:$0xff] %v619_v47  ;;  %v620_v53 = vadd.f32 %v1052_v18, %v529_v50  ;;  %v845_v54 = vpop.f32.mrb[11].mxu1 }
 0x10f   : > { %628 = vst [vmem:[%s1057_s18 + $0x28] sm:$0xff] %v610_v51  ;;  %638 = vst [vmem:[%s1057_s18 + $0x78] sm:$0xff] %v620_v53 }
 0x112   : > { %v494_v55 = vpop.f32.mrb[12].mxu0  ;;  %v534_v56 = vpop.f32.mrb[12].mxu1 }
 0x113   : > { %v611_v57 = vadd.f32 %v1052_v18, %v494_v55  ;;  %v828_v58 = vpop.f32.mrb[13].mxu0  ;;  %v621_v59 = vadd.f32 %v1052_v18, %v534_v56  ;;  %v848_v60 = vpop.f32.mrb[13].mxu1 }
 0x114   : > { %v497_v61 = vpop.f32.mrb[14].mxu0  ;;  %v537_v62 = vpop.f32.mrb[14].mxu1 }
 0x115   : > { %629 = vst [vmem:[%s1057_s18 + $0x30] sm:$0xff] %v611_v57  ;;  %v612_v63 = vadd.f32 %v1052_v18, %v497_v61  ;;  %v829_v0 = vpop.f32.mrb[15].mxu0  ;;  %639 = vst [vmem:[%s1057_s18 + $0x80] sm:$0xff] %v621_v59  ;;  %v622_v1 = vadd.f32 %v1052_v18, %v537_v62  ;;  %v849_v2 = vpop.f32.mrb[15].mxu1 }
 0x117   : > { %630 = vst [vmem:[%s1057_s18 + $0x38] sm:$0xff] %v612_v63  ;;  %640 = vst [vmem:[%s1057_s18 + $0x88] sm:$0xff] %v622_v1 }
 0x11a   : > { %v502_v3 = vpop.f32.mrb[16].mxu0 }
 0x11b   : > { %v613_v4 = vadd.f32 %v1052_v18, %v502_v3  ;;  %v832_v5 = vpop.f32.mrb[17].mxu0 }
 0x11c   : > { %v505_v6 = vpop.f32.mrb[18].mxu0 }
 0x11d   : > { %631 = vst [vmem:[%s1057_s18 + $0x40] sm:$0xff] %v613_v4  ;;  %v614_v7 = vadd.f32 %v1052_v18, %v505_v6  ;;  %v833_v8 = vpop.f32.mrb[19].mxu0 }
 0x11f   : > { %632 = vst [vmem:[%s1057_s18 + $0x48] sm:$0xff] %v614_v7 }
 0x120 PF: > { %s13_s14 = sadd.s32 1, %s931_s14   ;;  %s1108_s12 = smov %s927_s13 }
 0x121   : > { %p10_p5 = scmp.ge.s32.totalorder %s13_s14, 4   ;;  %s1109_s13 = smov %s1111_s15 }
 0x123   :  { %12 = sbr.rel (!%p10_p5) target bundleno = 2 (0x2), region = 76 }

// kernel: cnn_forward.9
= control target key start
LH: loop header
LB: loop body
LE: loop exit
PB: predicated region body
PF: predicated region fallthrough
CT: control target
= control target key end

     0   :  { %s565_s6 = smov 0   ;;  %s567_s7 = smov 0   ;;  %s625_s0 = inlined_call_operand.vmem [shape: f32[2,12,12,128], index: 0, kind: input, shape index: {}]   ;;  %s626_s1 = inlined_call_operand.vmem [shape: f32[2,6,6,128], index: 1, kind: output, shape index: {}]  }
   0x1   :  { %s569_s8 = smov 0   ;;  %s571_s9 = smov 0  }
   0x2   :  { %s573_s10 = smov 0  }
   0x3 LB: > { %s20_s11 = sadd.s32 1, %s541_s8  ;;  %s23_s12 = sadd.s32 1, %s545_s9  ;;  %s549_s10 = sphi %s573_s10, %s11_s10   ;;  %s545_s9 = sphi %s571_s9, %s630_s9   ;;  %s541_s8 = sphi %s569_s8, %s629_s8   ;;  %s537_s7 = sphi %s567_s7, %s628_s7   ;;  %s533_s6 = sphi %s565_s6, %s627_s6  }
   0x4   : > { %p21_p0 = scmp.ge.s32.totalorder %s20_s11, 6  ;;  %p422_p1 = scmp.ge.s32.totalorder %s549_s10, 1 }
   0x5   : > { %p109_p2 = scmp.lt.s32.totalorder %s549_s10, 13 }
   0x6   : > { %s632_s11 = smov (%p21_p0, %s20_s11), 0  ;;  %s634_s12 = smov (!%p21_p0, %s23_s12), %s545_s9 }
   0x7   : > { %p110_p3 = pnand %p422_p1, %p109_p2  ;;  %p25_p4 = scmp.ge.s32.totalorder %s634_s12, 2 }
   0x8   : > { %s423_s13 = sshll.u32 (!%p110_p3), %s533_s6, 1  ;;  %p138_p5 = scmp.lt.s32.totalorder (!%p110_p3), %s537_s7, 1  ;;  %v551_v0 = vmov (!%p110_p3), 0.0|0.0   ;;  %v163_v1 = vlaneseq (!%p110_p3)  ;;  %vm552_vm0 = vmmov (!%p110_p3), 0   ;;  %v553_v2 = vmov (!%p110_p3), 0.0  }
   0x9   : > { %s636_s12 = smov (%p25_p4, %s634_s12), 0  ;;  %113 = sbr.rel (%p110_p3) target bundleno = 248 (0xf8), region = 24 }
   0xa   : > { %457 = vmatprep.subr.bf16.mxu0 (!%p110_p3), %v551_v0  ;;  %461 = vmatprep.subr.bf16.mxu1 (!%p110_p3), %v551_v0  ;;  %p140_p6 = scmp.lt.s32.totalorder (!%p110_p3), %s423_s13, 11  ;;  %v164_v3 = vshrl.u32 (!%p110_p3), %v163_v1, 7  ;;  %v166_v5 = vand.u32 (!%p110_p3), 127, %v163_v1  ;;  %vm179_vm1 = vcmask (!%p110_p3), 1043456   ;;  %vm554_vm2 = vmmov (!%p110_p3), 1   ;;  %p150_p7 = scmp.lt.s32.totalorder (!%p110_p3), %s533_s6, 5 }
   0xb   : > { %447 = vmatprep.mubr.msk.f32.mxu0 (!%p110_p3), %vm552_vm0, %v553_v2  ;;  %454 = vmatprep.mubr.msk.f32.mxu1 (!%p110_p3), %vm552_vm0, %v553_v2  ;;  %vm459_vm3 = vmpackc.low (!%p110_p3), %vm179_vm1, %vm554_vm2  ;;  %vm175_vm6 = vcmask (!%p110_p3), 97280  }
   0xc   : > { %v167_v4 = vmul.u32 (!%p110_p3), 2, %v164_v3 }
   0xe   : > { %v171_v6 = vadd.s32 (!%p110_p3), 1, %v167_v4  ;;  %vm168_vm4 = vcmp.eq.s32.totalorder (!%p110_p3), %v166_v5, %v167_v4 }
   0xf   : > { %v429_v14 = vsel (!%p110_p3), %vm168_vm4, 1.0, %v553_v2 }
  0x10   : > { %s638_s7 = smov (!%p138_p5, %s537_s7), 1  ;;  %s640_s13 = smov (!%p140_p6, %s423_s13), 11  ;;  %vm172_vm5 = vcmp.eq.s32.totalorder %v166_v5, %v171_v6 }
  0x11   : > { %s465_s14 = smul.u32 24, %s638_s7  ;;  %s424_s15 = sshll.u32 %s640_s13, 1  ;;  %v430_v15 = vsel %vm172_vm5, 1.0, %v553_v2 }
  0x12   : > { %s642_s6 = smov (!%p150_p7, %s533_s6), 5  ;;  %s466_s21 = smul.u32 6, %s638_s7 }
  0x13   : > { %s144_s16 = sadd.s32 %s465_s14, %s424_s15 }
  0x14   : > { %s425_s17 = sshll.u32 %s144_s16, 3  ;;  %s153_s22 = sadd.s32 %s466_s21, %s642_s6 }
  0x15   : > { %s146_s20 = scalar_lea.vmem %s625_s0, %s425_s17  ;;  %s426_s23 = sshll.u32 %s153_s22, 3 }
  0x16   : > { %v156_v7 = vld [vmem:[%s146_s20] sm:$0xff]  ;;  %v157_v8 = vld [vmem:[%s146_s20 + $0x8] sm:$0xf]  ;;  %v427_v9 = vld [vmem:[%s146_s20 + $0x10] sm:$0xff]  ;;  %s155_s26 = scalar_lea.vmem %s626_s1, %s426_s23 }
  0x17   : > { %v428_v10 = vld [vmem:[%s146_s20 + $0x18] sm:$0xf]  ;;  %v161_v11 = vmax.f32 %v156_v7, %v427_v9 }
  0x18   : > { %v162_v12 = vmax.f32 %v157_v8, %v428_v10 }
  0x1a   : > { %v458_v13 = vpack.c.bf16 %v162_v12, %v161_v11 }
  0x1c   : > { %460 = vmatpush3.bf16.msk.msra.mxu0 %vm459_vm3, %v458_v13  ;;  %464 = vmatpush3.bf16.msk.msra.mxu1 %vm459_vm3, %v458_v13 }
  0x1f   : > { %448 = vmatmul.mubr.msk.f32.vlgmr.msra.gmra.mrb[0].mxu0 %vm175_vm6, %v429_v14  ;;  %455 = vmatmul.mubr.msk.f32.vlgmr.msra.gmra.mrb[0].mxu1 %vm175_vm6, %v430_v15 }
  0xf2   : > { %v249_v16 = vpop.f32.mrb[0].mxu0  ;;  %v322_v17 = vpop.f32.mrb[0].mxu1 }
  0xf3   : > { %v326_v18 = vmax.f32 %v249_v16, %v322_v17  ;;  %v449_v19 = vpop.f32.mrb[1].mxu0  ;;  %v456_v20 = vpop.f32.mrb[1].mxu1 }
  0xf5   : > { %v327_v21 = vmax.f32 %v326_v18, 0.0 }
  0xf7   : > { %328 = vst [vmem:[%s155_s26] sm:$0x3f] %v327_v21 }
  0xf8 PF: > { %s11_s10 = sadd.s32 1, %s549_s10   ;;  %s627_s6 = smov %s541_s8 }
  0xf9   : > { %p8_p8 = scmp.ge.s32.totalorder %s11_s10, 14   ;;  %s628_s7 = smov %s545_s9 }
  0xfa   : > { %s629_s8 = smov %s632_s11  ;;  %s630_s9 = smov %s636_s12 }
  0xfb   :  { %10 = sbr.rel (!%p8_p8) target bundleno = 3 (0x3), region = 55 }

// kernel: cnn_forward.10
= control target key start
LH: loop header
LB: loop body
LE: loop exit
PB: predicated region body
PF: predicated region fallthrough
CT: control target
= control target key end

     0   :  { %s1131_s12 = smov 0   ;;  %s1133_s13 = smov 0   ;;  %s1338_s0 = inlined_call_operand.vmem [shape: bf16[8,384], index: 0, kind: input, shape index: {}]   ;;  %s1339_s1 = inlined_call_operand.vmem [shape: bf16[384,256], index: 1, kind: input, shape index: {}]   ;;  %s1340_s2 = inlined_call_operand.vmem [shape: f32[1,256], index: 2, kind: input, shape index: {}]   ;;  %s1341_s3 = inlined_call_operand.vmem [shape: f32[8,256], index: 3, kind: output, shape index: {}]  }
   0x1   :  { %s1135_s14 = smov 0   ;;  %s1137_s15 = smov 0  }
   0x2   :  { %s1139_s16 = smov 0  }
   0x3 LB: > { %s28_s17 = sadd.s32 1, %s1103_s15  ;;  %p76_p1 = scmp.ne.s32.totalorder %s1095_s13, %s1091_s12  ;;  %s1107_s16 = sphi %s1139_s16, %s13_s16   ;;  %s1103_s15 = sphi %s1137_s15, %s1345_s15   ;;  %s1099_s14 = sphi %s1135_s14, %s1344_s14   ;;  %s1095_s13 = sphi %s1133_s13, %s1343_s13   ;;  %s1091_s12 = sphi %s1131_s12, %s1342_s12  }
   0x4   : > { %p30_p0 = scmp.ge.s32.totalorder %s28_s17, 2  ;;  %p77_p2 = scmp.eq.s32.totalorder %s1107_s16, 0 }
   0x5   : > { %s69_s19 = sadd.s32 1, %s1095_s13  ;;  %p913_p5 = scmp.ge.s32.totalorder %s1107_s16, 2 }
   0x6   : > { %s1347_s17 = smov (%p30_p0, %s28_s17), 0  ;;  %p78_p3 = por %p77_p2, %p76_p1 }
   0x7   : > { %s65_s18 = ssub.s32 %s1103_s15, %s1347_s17  ;;  %169 = sbr.rel (%p913_p5) target bundleno = 50 (0x32), region = 20 }
   0x8   : > { %p67_p4 = scmp.eq.s32.totalorder %s65_s18, 0 }
   0xa   : > { %s1166_s20 = scalar_select %p67_p4, %s1095_s13, %s69_s19  }
   0xe   : > { %172 = sbr.rel (!%p78_p3) target bundleno = 50 (0x32), region = 24  ;;  %s174_s21 = sand.u32 (%p78_p3), 1, %s1095_s13  }
   0xf   : > { %s914_s22 = sshll.u32 (%p78_p3), %s1103_s15, 2  ;;  %s998_s23 = smul.u32 (%p78_p3), 192, %s174_s21 }
  0x10   : > { %s1174_s26 = scalar_lea.vmem (%p78_p3), %s1339_s1, %s914_s22 }
  0x11   : > { %v197_v0 = vld [vmem:[%s1174_s26] sm:$0xf] (%p78_p3)  ;;  %v199_v1 = vld [vmem:[%s1174_s26 + $0x8] sm:$0xf] (%p78_p3)  ;;  %v201_v2 = vld [vmem:[%s1174_s26 + $0x10] sm:$0xf] (%p78_p3) }
  0x12   : > { %v203_v3 = vld [vmem:[%s1174_s26 + $0x18] sm:$0xf] (%p78_p3)  ;;  %v205_v4 = vld [vmem:[%s1174_s26 + $0x20] sm:$0xf] (%p78_p3)  ;;  %s1181_s27 = scalar_lea.vmem (%p78_p3), [#allocation3], %s998_s23 }
  0x13   : > { %198 = vst [vmem:[%s1181_s27] sm:$0xf] (%p78_p3), %v197_v0  ;;  %200 = vst [vmem:[%s1181_s27 + $0x4] sm:$0xf] (%p78_p3), %v199_v1  ;;  %v207_v5 = vld [vmem:[%s1174_s26 + $0x28] sm:$0xf] (%p78_p3) }
  0x14   : > { %202 = vst [vmem:[%s1181_s27 + $0x8] sm:$0xf] (%p78_p3), %v201_v2  ;;  %204 = vst [vmem:[%s1181_s27 + $0xc] sm:$0xf] (%p78_p3), %v203_v3  ;;  %v209_v6 = vld [vmem:[%s1174_s26 + $0x30] sm:$0xf] (%p78_p3) }
  0x15   : > { %206 = vst [vmem:[%s1181_s27 + $0x10] sm:$0xf] %v205_v4  ;;  %v211_v7 = vld [vmem:[%s1174_s26 + $0x38] sm:$0xf]  ;;  %208 = vst [vmem:[%s1181_s27 + $0x14] sm:$0xf] %v207_v5 }
  0x16   : > { %210 = vst [vmem:[%s1181_s27 + $0x18] sm:$0xf] %v209_v6  ;;  %212 = vst [vmem:[%s1181_s27 + $0x1c] sm:$0xf] %v211_v7  ;;  %v213_v8 = vld [vmem:[%s1174_s26 + $0x40] sm:$0xf] }
  0x17   : > { %v215_v9 = vld [vmem:[%s1174_s26 + $0x48] sm:$0xf]  ;;  %v217_v10 = vld [vmem:[%s1174_s26 + $0x50] sm:$0xf]  ;;  %214 = vst [vmem:[%s1181_s27 + $0x20] sm:$0xf] %v213_v8 }
  0x18   : > { %216 = vst [vmem:[%s1181_s27 + $0x24] sm:$0xf] %v215_v9  ;;  %218 = vst [vmem:[%s1181_s27 + $0x28] sm:$0xf] %v217_v10  ;;  %v219_v11 = vld [vmem:[%s1174_s26 + $0x58] sm:$0xf] }
  0x19   : > { %v221_v12 = vld [vmem:[%s1174_s26 + $0x60] sm:$0xf]  ;;  %v223_v13 = vld [vmem:[%s1174_s26 + $0x68] sm:$0xf]  ;;  %220 = vst [vmem:[%s1181_s27 + $0x2c] sm:$0xf] %v219_v11 }
  0x1a   : > { %222 = vst [vmem:[%s1181_s27 + $0x30] sm:$0xf] %v221_v12  ;;  %224 = vst [vmem:[%s1181_s27 + $0x34] sm:$0xf] %v223_v13  ;;  %v225_v14 = vld [vmem:[%s1174_s26 + $0x70] sm:$0xf] }
  0x1b   : > { %v227_v15 = vld [vmem:[%s1174_s26 + $0x78] sm:$0xf]  ;;  %v229_v16 = vld [vmem:[%s1174_s26 + $0x80] sm:$0xf]  ;;  %226 = vst [vmem:[%s1181_s27 + $0x38] sm:$0xf] %v225_v14 }
  0x1c   : > { %228 = vst [vmem:[%s1181_s27 + $0x3c] sm:$0xf] %v227_v15  ;;  %230 = vst [vmem:[%s1181_s27 + $0x40] sm:$0xf] %v229_v16  ;;  %v231_v17 = vld [vmem:[%s1174_s26 + $0x88] sm:$0xf] }
  0x1d   : > { %v233_v18 = vld [vmem:[%s1174_s26 + $0x90] sm:$0xf]  ;;  %v235_v19 = vld [vmem:[%s1174_s26 + $0x98] sm:$0xf]  ;;  %232 = vst [vmem:[%s1181_s27 + $0x44] sm:$0xf] %v231_v17 }
  0x1e   : > { %234 = vst [vmem:[%s1181_s27 + $0x48] sm:$0xf] %v233_v18  ;;  %236 = vst [vmem:[%s1181_s27 + $0x4c] sm:$0xf] %v235_v19  ;;  %v237_v20 = vld [vmem:[%s1174_s26 + $0xa0] sm:$0xf] }
  0x1f   : > { %v239_v21 = vld [vmem:[%s1174_s26 + $0xa8] sm:$0xf]  ;;  %v241_v22 = vld [vmem:[%s1174_s26 + $0xb0] sm:$0xf]  ;;  %238 = vst [vmem:[%s1181_s27 + $0x50] sm:$0xf] %v237_v20 }
  0x20   : > { %240 = vst [vmem:[%s1181_s27 + $0x54] sm:$0xf] %v239_v21  ;;  %242 = vst [vmem:[%s1181_s27 + $0x58] sm:$0xf] %v241_v22  ;;  %v243_v23 = vld [vmem:[%s1174_s26 + $0xb8] sm:$0xf] }
  0x21   : > { %v245_v24 = vld [vmem:[%s1174_s26 + $0xc0] sm:$0xf]  ;;  %v247_v25 = vld [vmem:[%s1174_s26 + $0xc8] sm:$0xf]  ;;  %244 = vst [vmem:[%s1181_s27 + $0x5c] sm:$0xf] %v243_v23 }
  0x22   : > { %246 = vst [vmem:[%s1181_s27 + $0x60] sm:$0xf] %v245_v24  ;;  %248 = vst [vmem:[%s1181_s27 + $0x64] sm:$0xf] %v247_v25  ;;  %v249_v26 = vld [vmem:[%s1174_s26 + $0xd0] sm:$0xf] }
  0x23   : > { %v251_v27 = vld [vmem:[%s1174_s26 + $0xd8] sm:$0xf]  ;;  %v253_v28 = vld [vmem:[%s1174_s26 + $0xe0] sm:$0xf]  ;;  %250 = vst [vmem:[%s1181_s27 + $0x68] sm:$0xf] %v249_v26 }
  0x24   : > { %252 = vst [vmem:[%s1181_s27 + $0x6c] sm:$0xf] %v251_v27  ;;  %254 = vst [vmem:[%s1181_s27 + $0x70] sm:$0xf] %v253_v28  ;;  %v255_v29 = vld [vmem:[%s1174_s26 + $0xe8] sm:$0xf] }
  0x25   : > { %v257_v30 = vld [vmem:[%s1174_s26 + $0xf0] sm:$0xf]  ;;  %v259_v31 = vld [vmem:[%s1174_s26 + $0xf8] sm:$0xf]  ;;  %256 = vst [vmem:[%s1181_s27 + $0x74] sm:$0xf] %v255_v29 }
  0x26   : > { %258 = vst [vmem:[%s1181_s27 + $0x78] sm:$0xf] %v257_v30  ;;  %260 = vst [vmem:[%s1181_s27 + $0x7c] sm:$0xf] %v259_v31  ;;  %v261_v32 = vld [vmem:[%s1174_s26 + $0x100] sm:$0xf] }
  0x27   : > { %v263_v33 = vld [vmem:[%s1174_s26 + $0x108] sm:$0xf]  ;;  %v265_v34 = vld [vmem:[%s1174_s26 + $0x110] sm:$0xf]  ;;  %262 = vst [vmem:[%s1181_s27 + $0x80] sm:$0xf] %v261_v32 }
  0x28   : > { %264 = vst [vmem:[%s1181_s27 + $0x84] sm:$0xf] %v263_v33  ;;  %266 = vst [vmem:[%s1181_s27 + $0x88] sm:$0xf] %v265_v34  ;;  %v267_v35 = vld [vmem:[%s1174_s26 + $0x118] sm:$0xf] }
  0x29   : > { %v269_v36 = vld [vmem:[%s1174_s26 + $0x120] sm:$0xf]  ;;  %v271_v37 = vld [vmem:[%s1174_s26 + $0x128] sm:$0xf]  ;;  %268 = vst [vmem:[%s1181_s27 + $0x8c] sm:$0xf] %v267_v35 }
  0x2a   : > { %270 = vst [vmem:[%s1181_s27 + $0x90] sm:$0xf] %v269_v36  ;;  %272 = vst [vmem:[%s1181_s27 + $0x94] sm:$0xf] %v271_v37  ;;  %v273_v38 = vld [vmem:[%s1174_s26 + $0x130] sm:$0xf] }
  0x2b   : > { %v275_v39 = vld [vmem:[%s1174_s26 + $0x138] sm:$0xf]  ;;  %v277_v40 = vld [vmem:[%s1174_s26 + $0x140] sm:$0xf]  ;;  %274 = vst [vmem:[%s1181_s27 + $0x98] sm:$0xf] %v273_v38 }
  0x2c   : > { %276 = vst [vmem:[%s1181_s27 + $0x9c] sm:$0xf] %v275_v39  ;;  %278 = vst [vmem:[%s1181_s27 + $0xa0] sm:$0xf] %v277_v40  ;;  %v279_v41 = vld [vmem:[%s1174_s26 + $0x148] sm:$0xf] }
  0x2d   : > { %v281_v42 = vld [vmem:[%s1174_s26 + $0x150] sm:$0xf]  ;;  %v283_v43 = vld [vmem:[%s1174_s26 + $0x158] sm:$0xf]  ;;  %280 = vst [vmem:[%s1181_s27 + $0xa4] sm:$0xf] %v279_v41 }
  0x2e   : > { %282 = vst [vmem:[%s1181_s27 + $0xa8] sm:$0xf] %v281_v42  ;;  %284 = vst [vmem:[%s1181_s27 + $0xac] sm:$0xf] %v283_v43  ;;  %v285_v44 = vld [vmem:[%s1174_s26 + $0x160] sm:$0xf] }
  0x2f   : > { %v287_v45 = vld [vmem:[%s1174_s26 + $0x168] sm:$0xf]  ;;  %v289_v46 = vld [vmem:[%s1174_s26 + $0x170] sm:$0xf]  ;;  %286 = vst [vmem:[%s1181_s27 + $0xb0] sm:$0xf] %v285_v44 }
  0x30   : > { %288 = vst [vmem:[%s1181_s27 + $0xb4] sm:$0xf] %v287_v45  ;;  %290 = vst [vmem:[%s1181_s27 + $0xb8] sm:$0xf] %v289_v46  ;;  %v291_v47 = vld [vmem:[%s1174_s26 + $0x178] sm:$0xf] }
  0x31   : > { %292 = vst [vmem:[%s1181_s27 + $0xbc] sm:$0xf] %v291_v47 }
  0x32 PF: > { %p915_p6 = scmp.ge.s32.totalorder %s1107_s16, 1  ;;  %p416_p7 = scmp.lt.s32.totalorder %s1107_s16, 3 }
  0x34   : > { %p417_p8 = pnand %p915_p6, %p416_p7 }
  0x35   : > { %s423_s28 = sand.u32 (!%p417_p8), 1, %s1091_s12   ;;  %v1280_v48 = vld [vmem:[%s1338_s0] sm:$0xff] (!%p417_p8)  ;;  %v1109_v49 = vmov (!%p417_p8), 0.0   ;;  %vm1110_vm0 = vmmov (!%p417_p8), 0   ;;  %v1068_v12 = vld [vmem:[%s1338_s0 + $0x8] ss:$0 sps:$4 sm:$0xff] (!%p417_p8)  }
  0x36   : > { %420 = sbr.rel (%p417_p8) target bundleno = 311 (0x137), region = 69  ;;  %978 = vmatprep.subr.bf16.mxu1 (!%p417_p8), %v1109_v49  ;;  %v918_v50 = vcombine.high (!%p417_p8), %v1280_v48, %v1280_v48  ;;  %994 = vmatprep.mubr.msk.bf16.mxu1 (!%p417_p8), %vm1110_vm0, %v1109_v49  ;;  %v917_v11 = vcombine.low (!%p417_p8), %v1280_v48, %v1280_v48  ;;  %p472_p9 = scmp.lt.s32.totalorder (!%p417_p8), %s1099_s14, 1 }
  0x37   : > { %s999_s4 = smul.u32 (!%p417_p8), 192, %s423_s28 }
  0x38   : > { %727 = vmatprep.mubr.bf16.mxu0 (!%p417_p8), %v918_v50 }
  0x39   : > { %s1284_s5 = scalar_lea.vmem (!%p417_p8), [#allocation3], %s999_s4 }
  0x3a   : > { %v1042_v51 = vld [vmem:[%s1284_s5 + $0x40] sm:$0xff] (!%p417_p8)   ;;  %v1045_v54 = vld [vmem:[%s1284_s5 + $0x48] sm:$0xff] (!%p417_p8)   ;;  %v1048_v57 = vld [vmem:[%s1284_s5 + $0x50] sm:$0xff] (!%p417_p8)  }
  0x3b   : > { %v1043_v52 = vld [vmem:[%s1284_s5] sm:$0xff] (!%p417_p8)   ;;  %947 = vmatprep.subr.bf16.mxu0 (!%p417_p8), %v1042_v51  ;;  %v1046_v55 = vld [vmem:[%s1284_s5 + $0x8] sm:$0xff] (!%p417_p8)   ;;  %v1049_v58 = vld [vmem:[%s1284_s5 + $0x10] sm:$0xff] (!%p417_p8)  }
  0x3c   : > { %v1044_v53 = vld [vmem:[%s1284_s5 + $0x80] sm:$0xff] (!%p417_p8)   ;;  %948 = vmatpush3.bf16.msra.mxu0 (!%p417_p8), %v1043_v52  ;;  %v1047_v56 = vld [vmem:[%s1284_s5 + $0x88] sm:$0xff] (!%p417_p8)   ;;  %v1050_v59 = vld [vmem:[%s1284_s5 + $0x90] sm:$0xff] (!%p417_p8)  }
  0x3d   : > { %979 = vmatpush3.bf16.msra.mxu1 %v1044_v53  ;;  %949 = vmatprep.subr.bf16.mxu0 %v1045_v54  ;;  %v1051_v60 = vld [vmem:[%s1284_s5 + $0x58] sm:$0xff]   ;;  %v1054_v63 = vld [vmem:[%s1284_s5 + $0x60] sm:$0xff]   ;;  %v1057_v2 = vld [vmem:[%s1284_s5 + $0x68] sm:$0xff]   ;;  %s1349_s14 = smov (!%p472_p9, %s1099_s14), 1 }
  0x3e   : > { %980 = vmatprep.subr.bf16.mxu1 %v1109_v49  ;;  %v1052_v61 = vld [vmem:[%s1284_s5 + $0x18] sm:$0xff]   ;;  %v1055_v0 = vld [vmem:[%s1284_s5 + $0x20] sm:$0xff]   ;;  %v1058_v3 = vld [vmem:[%s1284_s5 + $0x28] sm:$0xff]   ;;  %s474_s10 = scalar_lea.vmem %s1340_s2, %s1349_s14  ;;  %s916_s11 = sshll.u32 %s1349_s14, 3 }
  0x3f   : > { %v1053_v62 = vld [vmem:[%s1284_s5 + $0x98] sm:$0xff]   ;;  %v1056_v1 = vld [vmem:[%s1284_s5 + $0xa0] sm:$0xff]   ;;  %v1059_v4 = vld [vmem:[%s1284_s5 + $0xa8] sm:$0xff]   ;;  %s482_s19 = scalar_lea.vmem %s1341_s3, %s916_s11 }
  0x40   : > { %950 = vmatpush3.bf16.msra.mxu0 %v1046_v55  ;;  %v1060_v5 = vld [vmem:[%s1284_s5 + $0x70] sm:$0xff]   ;;  %v1063_v8 = vld [vmem:[%s1284_s5 + $0x78] sm:$0xff]   ;;  %v944_v19 = vld [vmem:[%s474_s10] ss:$0 sm:$0xff] }
  0x41   : > { %981 = vmatpush3.bf16.msra.mxu1 %v1047_v56  ;;  %951 = vmatprep.subr.bf16.mxu0 %v1048_v57  ;;  %v1061_v6 = vld [vmem:[%s1284_s5 + $0x30] sm:$0xff]   ;;  %v1064_v9 = vld [vmem:[%s1284_s5 + $0x38] sm:$0xff]  }
  0x42   : > { %982 = vmatprep.subr.bf16.mxu1 %v1109_v49  ;;  %v1062_v7 = vld [vmem:[%s1284_s5 + $0xb0] sm:$0xff]   ;;  %v1065_v10 = vld [vmem:[%s1284_s5 + $0xb8] sm:$0xff]  }
  0x44   : > { %952 = vmatpush3.bf16.msra.mxu0 %v1049_v58 }
  0x45   : > { %983 = vmatpush3.bf16.msra.mxu1 %v1050_v59  ;;  %953 = vmatprep.subr.bf16.mxu0 %v1051_v60 }
  0x46   : > { %984 = vmatprep.subr.bf16.mxu1 %v1109_v49 }
  0x48   : > { %954 = vmatpush3.bf16.msra.mxu0 %v1052_v61 }
  0x49   : > { %985 = vmatpush3.bf16.msra.mxu1 %v1053_v62  ;;  %955 = vmatprep.subr.bf16.mxu0 %v1054_v63 }
  0x4a   : > { %986 = vmatprep.subr.bf16.mxu1 %v1109_v49 }
  0x4c   : > { %956 = vmatpush3.bf16.msra.mxu0 %v1055_v0 }
  0x4d   : > { %987 = vmatpush3.bf16.msra.mxu1 %v1056_v1  ;;  %957 = vmatprep.subr.bf16.mxu0 %v1057_v2 }
  0x4e   : > { %988 = vmatprep.subr.bf16.mxu1 %v1109_v49 }
  0x50   : > { %958 = vmatpush3.bf16.msra.mxu0 %v1058_v3 }
  0x51   : > { %989 = vmatpush3.bf16.msra.mxu1 %v1059_v4  ;;  %959 = vmatprep.subr.bf16.mxu0 %v1060_v5 }
  0x52   : > { %990 = vmatprep.subr.bf16.mxu1 %v1109_v49 }
  0x54   : > { %960 = vmatpush3.bf16.msra.mxu0 %v1061_v6 }
  0x55   : > { %991 = vmatpush3.bf16.msra.mxu1 %v1062_v7  ;;  %961 = vmatprep.subr.bf16.mxu0 %v1063_v8 }
  0x56   : > { %992 = vmatprep.subr.bf16.mxu1 %v1109_v49 }
  0x58   : > { %962 = vmatpush3.bf16.msra.mxu0 %v1064_v9 }
  0x59   : > { %993 = vmatpush3.bf16.msra.mxu1 %v1065_v10 }
  0x5b   : > { %728 = vmatmul.mubr.bf16.vlgmr.msra.gmra.mrb[0].mxu0 %v917_v11 }
  0x5c   : > { %995 = vmatmul.mubr.bf16.vlgmr.msra.gmra.mrb[0].mxu1 %v1068_v12 }
 0x12e   : > { %v963_v13 = vpop.f32.mrb[0].mxu0 }
 0x12f   : > { %v769_v14 = vpop.f32.mrb[0].mxu1  ;;  %v964_v15 = vpop.f32.mrb[1].mxu0 }
 0x130   : > { %v965_v16 = vadd.f32 %v964_v15, %v963_v13  ;;  %v996_v17 = vpop.f32.mrb[1].mxu1  ;;  %v966_v18 = vpop.f32.mrb[2].mxu0 }
 0x131   : > { %v772_v20 = vpop.f32.mrb[2].mxu1  ;;  %v967_v21 = vpop.f32.mrb[3].mxu0 }
 0x132   : > { %v770_v22 = vadd.f32 %v965_v16, %v769_v14  ;;  %v997_v23 = vpop.f32.mrb[3].mxu1 }
 0x134   : > { %v788_v24 = vadd.f32 %v944_v19, %v770_v22 }
 0x136   : > { %789 = vst [vmem:[%s482_s19] sm:$0xff] %v788_v24 }
 0x137 PF: > { %s13_s16 = sadd.s32 1, %s1107_s16   ;;  %s1342_s12 = smov %s1095_s13 }
 0x138   : > { %p10_p10 = scmp.ge.s32.totalorder %s13_s16, 4   ;;  %s1343_s13 = smov %s1166_s20 }
 0x139   : > { %s1344_s14 = smov %s1103_s15  ;;  %s1345_s15 = smov %s1347_s17 }
 0x13a   :  { %12 = sbr.rel (!%p10_p10) target bundleno = 3 (0x3), region = 122 }

// kernel: cnn_forward.11
= control target key start
LH: loop header
LB: loop body
LE: loop exit
PB: predicated region body
PF: predicated region fallthrough
CT: control target
= control target key end

     0   :  { %v1461_v0 = vmov 0.0|0.0   ;;  %vm1462_vm0 = vmmov 0   ;;  %v1463_v4 = vmov 0.0   ;;  %s2088_s1 = inlined_call_operand.vmem [shape: f32[5,128,128], index: 1, kind: input, shape index: {}]   ;;  %s2089_s0 = inlined_call_operand.vmem [shape: f32[8,128], index: 0, kind: input, shape index: {}]   ;;  %s2090_s2 = inlined_call_operand.vmem [shape: f32[5,1,128], index: 2, kind: input, shape index: {}]   ;;  %s2091_s3 = inlined_call_operand.vmem [shape: f32[128,256], index: 3, kind: input, shape index: {}]   ;;  %s2092_s5 = inlined_call_operand.vmem [shape: f32[256,128], index: 5, kind: input, shape index: {}]   ;;  %s2093_s7 = inlined_call_operand.vmem [shape: f32[128,128], index: 7, kind: input, shape index: {}]   ;;  %s2094_s4 = inlined_call_operand.vmem [shape: f32[8,256], index: 4, kind: input, shape index: {}]   ;;  %s2095_s6 = inlined_call_operand.vmem [shape: f32[1,128], index: 6, kind: input, shape index: {}]   ;;  %s2096_s8 = inlined_call_operand.vmem [shape: f32[1,128], index: 8, kind: input, shape index: {}]   ;;  %s2097_s9 = inlined_call_operand.vmem [shape: f32[8,128], index: 9, kind: output, shape index: {}]  }
   0x1   :  { %1250 = vmatprep.subr.bf16.mxu0 %v1461_v0  ;;  %v33_v1 = vld [vmem:[%s2088_s1] sm:$0xff]  ;;  %v34_v2 = vld [vmem:[%s2088_s1 + $0x8] sm:$0xff]  ;;  %v35_v3 = vld [vmem:[%s2088_s1 + $0x10] sm:$0xff]  ;;  %1072 = vmatprep.mubr.msk.f32.mxu0 %vm1462_vm0, %v1463_v4 }
   0x2   :  { %v1251_v5 = vpack.c.bf16 %v34_v2, %v33_v1  ;;  %v36_v6 = vld [vmem:[%s2088_s1 + $0x18] sm:$0xff]  ;;  %1274 = vmatprep.subr.bf16.mxu1 %v1461_v0  ;;  %1107 = vmatprep.mubr.msk.f32.mxu1 %vm1462_vm0, %v1463_v4  ;;  %v37_v8 = vld [vmem:[%s2088_s1 + $0x20] sm:$0xff]  ;;  %v38_v9 = vld [vmem:[%s2088_s1 + $0x28] sm:$0xff] }
   0x3   :  { %v1254_v7 = vpack.c.bf16 %v36_v6, %v35_v3  ;;  %v829_v10 = vld [vmem:[%s2088_s1 + $0x80] sm:$0xff]  ;;  %v830_v11 = vld [vmem:[%s2088_s1 + $0x88] sm:$0xff]  ;;  %v831_v12 = vld [vmem:[%s2088_s1 + $0x90] sm:$0xff]  ;;  %v1257_v14 = vpack.c.bf16 %v38_v9, %v37_v8 }
   0x4   :  { %1252 = vmatpush3.bf16.msra.mxu0 %v1251_v5  ;;  %v832_v13 = vld [vmem:[%s2088_s1 + $0x98] sm:$0xff]  ;;  %v1275_v15 = vpack.c.bf16 %v830_v11, %v829_v10  ;;  %v39_v16 = vld [vmem:[%s2088_s1 + $0x30] sm:$0xff]  ;;  %v833_v19 = vld [vmem:[%s2088_s1 + $0xa0] sm:$0xff] }
   0x5   :  { %1253 = vmatprep.subr.bf16.mxu0 %v1461_v0  ;;  %v40_v17 = vld [vmem:[%s2088_s1 + $0x38] sm:$0xff]  ;;  %v1278_v18 = vpack.c.bf16 %v832_v13, %v831_v12  ;;  %v834_v20 = vld [vmem:[%s2088_s1 + $0xa8] sm:$0xff]  ;;  %v41_v22 = vld [vmem:[%s2088_s1 + $0x40] sm:$0xff] }
   0x6   :  { %1276 = vmatpush3.bf16.msra.mxu1 %v1275_v15  ;;  %v1260_v21 = vpack.c.bf16 %v40_v17, %v39_v16  ;;  %v42_v23 = vld [vmem:[%s2088_s1 + $0x48] sm:$0xff]  ;;  %v1281_v24 = vpack.c.bf16 %v834_v20, %v833_v19  ;;  %v835_v25 = vld [vmem:[%s2088_s1 + $0xb0] sm:$0xff]  ;;  %v836_v26 = vld [vmem:[%s2088_s1 + $0xb8] sm:$0xff] }
   0x7   :  { %1277 = vmatprep.subr.bf16.mxu1 %v1461_v0  ;;  %v1263_v27 = vpack.c.bf16 %v42_v23, %v41_v22  ;;  %v43_v28 = vld [vmem:[%s2088_s1 + $0x50] sm:$0xff]  ;;  %v44_v29 = vld [vmem:[%s2088_s1 + $0x58] sm:$0xff]  ;;  %v1284_v30 = vpack.c.bf16 %v836_v26, %v835_v25  ;;  %v837_v31 = vld [vmem:[%s2088_s1 + $0xc0] sm:$0xff] }
   0x8   :  { %1255 = vmatpush3.bf16.msra.mxu0 %v1254_v7  ;;  %v838_v32 = vld [vmem:[%s2088_s1 + $0xc8] sm:$0xff]  ;;  %v1266_v33 = vpack.c.bf16 %v44_v29, %v43_v28  ;;  %v45_v34 = vld [vmem:[%s2088_s1 + $0x60] sm:$0xff]  ;;  %v839_v37 = vld [vmem:[%s2088_s1 + $0xd0] sm:$0xff] }
   0x9   :  { %1256 = vmatprep.subr.bf16.mxu0 %v1461_v0  ;;  %v46_v35 = vld [vmem:[%s2088_s1 + $0x68] sm:$0xff]  ;;  %v1287_v36 = vpack.c.bf16 %v838_v32, %v837_v31  ;;  %v840_v38 = vld [vmem:[%s2088_s1 + $0xd8] sm:$0xff]  ;;  %v47_v40 = vld [vmem:[%s2088_s1 + $0x70] sm:$0xff] }
   0xa   :  { %1279 = vmatpush3.bf16.msra.mxu1 %v1278_v18  ;;  %v1269_v39 = vpack.c.bf16 %v46_v35, %v45_v34  ;;  %v48_v41 = vld [vmem:[%s2088_s1 + $0x78] sm:$0xff]  ;;  %v1290_v42 = vpack.c.bf16 %v840_v38, %v839_v37  ;;  %v841_v43 = vld [vmem:[%s2088_s1 + $0xe0] sm:$0xff]  ;;  %v842_v44 = vld [vmem:[%s2088_s1 + $0xe8] sm:$0xff] }
   0xb   :  { %1280 = vmatprep.subr.bf16.mxu1 %v1461_v0  ;;  %v1272_v45 = vpack.c.bf16 %v48_v41, %v47_v40  ;;  %v1293_v46 = vpack.c.bf16 %v842_v44, %v841_v43  ;;  %v32_v47 = vld [vmem:[%s2089_s0] sm:$0xff]  ;;  %v843_v48 = vld [vmem:[%s2088_s1 + $0xf0] sm:$0xff]  ;;  %v844_v49 = vld [vmem:[%s2088_s1 + $0xf8] sm:$0xff] }
   0xc   :  { %1258 = vmatpush3.bf16.msra.mxu0 %v1257_v14  ;;  %v1296_v50 = vpack.c.bf16 %v844_v49, %v843_v48  ;;  %v847_v51 = vld [vmem:[%s2088_s1 + $0x100] sm:$0xff]  ;;  %v848_v52 = vld [vmem:[%s2088_s1 + $0x108] sm:$0xff]  ;;  %v849_v53 = vld [vmem:[%s2088_s1 + $0x110] sm:$0xff] }
   0xd   :  { %1259 = vmatprep.subr.bf16.mxu0 %v1461_v0  ;;  %v1299_v54 = vpack.c.bf16 %v848_v52, %v847_v51  ;;  %v850_v55 = vld [vmem:[%s2088_s1 + $0x118] sm:$0xff]  ;;  %v851_v57 = vld [vmem:[%s2088_s1 + $0x120] sm:$0xff]  ;;  %v852_v58 = vld [vmem:[%s2088_s1 + $0x128] sm:$0xff] }
   0xe   :  { %1282 = vmatpush3.bf16.msra.mxu1 %v1281_v24  ;;  %v1302_v56 = vpack.c.bf16 %v850_v55, %v849_v53  ;;  %v1305_v59 = vpack.c.bf16 %v852_v58, %v851_v57  ;;  %v853_v60 = vld [vmem:[%s2088_s1 + $0x130] sm:$0xff]  ;;  %v854_v61 = vld [vmem:[%s2088_s1 + $0x138] sm:$0xff]  ;;  %v855_v63 = vld [vmem:[%s2088_s1 + $0x140] sm:$0xff] }
   0xf   :  { %1283 = vmatprep.subr.bf16.mxu1 %v1461_v0  ;;  %v1308_v62 = vpack.c.bf16 %v854_v61, %v853_v60  ;;  %v856_v1 = vld [vmem:[%s2088_s1 + $0x148] sm:$0xff]  ;;  %v857_v3 = vld [vmem:[%s2088_s1 + $0x150] sm:$0xff]  ;;  %v858_v5 = vld [vmem:[%s2088_s1 + $0x158] sm:$0xff] }
  0x10   :  { %1261 = vmatpush3.bf16.msra.mxu0 %v1260_v21  ;;  %v1311_v2 = vpack.c.bf16 %v856_v1, %v855_v63  ;;  %v1314_v6 = vpack.c.bf16 %v858_v5, %v857_v3  ;;  %v859_v7 = vld [vmem:[%s2088_s1 + $0x160] sm:$0xff]  ;;  %v860_v8 = vld [vmem:[%s2088_s1 + $0x168] sm:$0xff]  ;;  %v861_v15 = vld [vmem:[%s2088_s1 + $0x170] sm:$0xff] }
  0x11   :  { %1262 = vmatprep.subr.bf16.mxu0 %v1461_v0  ;;  %v1317_v9 = vpack.c.bf16 %v860_v8, %v859_v7  ;;  %v828_v10 = vld [vmem:[%s2090_s2] ss:$0 sm:$0xff]  ;;  %v862_v16 = vld [vmem:[%s2088_s1 + $0x178] sm:$0xff]  ;;  %v866_v19 = vld [vmem:[%s2088_s1 + $0x188] sm:$0xff] }
  0x12   :  { %1285 = vmatpush3.bf16.msra.mxu1 %v1284_v30  ;;  %v1320_v17 = vpack.c.bf16 %v862_v16, %v861_v15  ;;  %v865_v18 = vld [vmem:[%s2088_s1 + $0x180] sm:$0xff]  ;;  %v867_v20 = vld [vmem:[%s2088_s1 + $0x190] sm:$0xff]  ;;  %v868_v22 = vld [vmem:[%s2088_s1 + $0x198] sm:$0xff] }
  0x13   :  { %1286 = vmatprep.subr.bf16.mxu1 %v1461_v0  ;;  %v1323_v21 = vpack.c.bf16 %v866_v19, %v865_v18  ;;  %v1326_v23 = vpack.c.bf16 %v868_v22, %v867_v20  ;;  %v869_v24 = vld [vmem:[%s2088_s1 + $0x1a0] sm:$0xff]  ;;  %v870_v25 = vld [vmem:[%s2088_s1 + $0x1a8] sm:$0xff]  ;;  %v872_v28 = vld [vmem:[%s2088_s1 + $0x1b8] sm:$0xff] }
  0x14   :  { %1264 = vmatpush3.bf16.msra.mxu0 %v1263_v27  ;;  %v1329_v26 = vpack.c.bf16 %v870_v25, %v869_v24  ;;  %v871_v27 = vld [vmem:[%s2088_s1 + $0x1b0] sm:$0xff]  ;;  %v873_v30 = vld [vmem:[%s2088_s1 + $0x1c0] sm:$0xff]  ;;  %v874_v31 = vld [vmem:[%s2088_s1 + $0x1c8] sm:$0xff] }
  0x15   :  { %1265 = vmatprep.subr.bf16.mxu0 %v1461_v0  ;;  %v1332_v29 = vpack.c.bf16 %v872_v28, %v871_v27  ;;  %v1335_v32 = vpack.c.bf16 %v874_v31, %v873_v30  ;;  %v876_v34 = vld [vmem:[%s2088_s1 + $0x1d8] sm:$0xff]  ;;  %v878_v37 = vld [vmem:[%s2088_s1 + $0x1e8] sm:$0xff]  ;;  %v879_v44 = vld [vmem:[%s2088_s1 + $0x1f0] sm:$0xff] }
  0x16   :  { %1288 = vmatpush3.bf16.msra.mxu1 %v1287_v36  ;;  %v877_v36 = vld [vmem:[%s2088_s1 + $0x1e0] sm:$0xff]  ;;  %v884_v48 = vld [vmem:[%s2088_s1 + $0x208] sm:$0xff]  ;;  %v885_v49 = vld [vmem:[%s2088_s1 + $0x210] sm:$0xff] }
  0x17   :  { %1289 = vmatprep.subr.bf16.mxu1 %v1461_v0  ;;  %v1341_v38 = vpack.c.bf16 %v878_v37, %v877_v36  ;;  %v886_v51 = vld [vmem:[%s2088_s1 + $0x218] sm:$0xff]  ;;  %v887_v53 = vld [vmem:[%s2088_s1 + $0x220] sm:$0xff]  ;;  %v892_v60 = vld [vmem:[%s2088_s1 + $0x248] sm:$0xff] }
  0x18   :  { %1267 = vmatpush3.bf16.msra.mxu0 %v1266_v33  ;;  %v875_v33 = vld [vmem:[%s2088_s1 + $0x1d0] sm:$0xff]  ;;  %v1350_v52 = vpack.c.bf16 %v886_v51, %v885_v49  ;;  %v890_v57 = vld [vmem:[%s2088_s1 + $0x238] sm:$0xff]  ;;  %v896_v3 = vld [vmem:[%s2088_s1 + $0x268] sm:$0xff] }
  0x19   :  { %1268 = vmatprep.subr.bf16.mxu0 %v1461_v0  ;;  %v1338_v35 = vpack.c.bf16 %v876_v34, %v875_v33  ;;  %v894_v63 = vld [vmem:[%s2088_s1 + $0x258] sm:$0xff]  ;;  %v513_v16 = vld [vmem:[%s2091_s3] sm:$0xff]  ;;  %v515_v18 = vld [vmem:[%s2091_s3 + $0x10] sm:$0xff] }
  0x1a   :  { %1291 = vmatpush3.bf16.msra.mxu1 %v1290_v42  ;;  %v516_v15 = vld [vmem:[%s2091_s3 + $0x18] sm:$0xff]  ;;  %v518_v19 = vld [vmem:[%s2091_s3 + $0x28] sm:$0xff]  ;;  %v519_v24 = vld [vmem:[%s2091_s3 + $0x30] sm:$0xff] }
  0x1b   :  { %1292 = vmatprep.subr.bf16.mxu1 %v1461_v0  ;;  %v520_v20 = vld [vmem:[%s2091_s3 + $0x38] sm:$0xff]  ;;  %v522_v25 = vld [vmem:[%s2091_s3 + $0x48] sm:$0xff]  ;;  %v523_v30 = vld [vmem:[%s2091_s3 + $0x50] sm:$0xff] }
  0x1c   :  { %1270 = vmatpush3.bf16.msra.mxu0 %v1269_v39  ;;  %v846_v39 = vld [vmem:[%s2090_s2 + $0x1] ss:$0 sm:$0xff]  ;;  %v1374_v22 = vpack.c.bf16 %v520_v20, %v518_v19  ;;  %v526_v31 = vld [vmem:[%s2091_s3 + $0x68] sm:$0xff]  ;;  %v527_v36 = vld [vmem:[%s2091_s3 + $0x70] sm:$0xff] }
  0x1d   :  { %1271 = vmatprep.subr.bf16.mxu0 %v1461_v0  ;;  %v530_v37 = vld [vmem:[%s2091_s3 + $0x88] sm:$0xff]  ;;  %v624_v20 = vld [vmem:[%s2092_s5 + $0x20] sm:$0xff] }
  0x1e   :  { %1294 = vmatpush3.bf16.msra.mxu1 %v1293_v46  ;;  %v538_v49 = vld [vmem:[%s2091_s3 + $0xc8] sm:$0xff] }
  0x1f   :  { %1295 = vmatprep.subr.bf16.mxu1 %v1461_v0 }
  0x20   :  { %1273 = vmatpush3.bf16.msra.mxu0 %v1272_v45  ;;  %v880_v45 = vld [vmem:[%s2088_s1 + $0x1f8] sm:$0xff] }
  0x21   :  { %1298 = vmatprep.subr.bf16.mxu0 %v1461_v0  ;;  %v1344_v46 = vpack.c.bf16 %v880_v45, %v879_v44  ;;  %v536_v44 = vld [vmem:[%s2091_s3 + $0xb8] sm:$0xff] }
  0x22   :  { %1297 = vmatpush3.bf16.msra.mxu1 %v1296_v50 }
  0x23   :  { %1073 = vmatmul.mubr.f32.vlgmr.msra.gmra.mrb[0].mxu0 %v32_v47  ;;  %1322 = vmatprep.subr.bf16.mxu1 %v1461_v0  ;;  %v883_v47 = vld [vmem:[%s2088_s1 + $0x200] sm:$0xff] }
  0x24   :  { %1142 = vmatprep.mubr.msk.f32.mxu0 %vm1462_vm0, %v1463_v4  ;;  %1300 = vmatpush3.bf16.msra.mxu0 %v1299_v54  ;;  %v1347_v50 = vpack.c.bf16 %v884_v48, %v883_v47  ;;  %v888_v54 = vld [vmem:[%s2088_s1 + $0x228] sm:$0xff]  ;;  %v533_v47 = vld [vmem:[%s2091_s3 + $0xa0] sm:$0xff]  ;;  %v535_v48 = vld [vmem:[%s2091_s3 + $0xb0] sm:$0xff] }
  0x25   :  { %1301 = vmatprep.subr.bf16.mxu0 %v1461_v0  ;;  %v1353_v55 = vpack.c.bf16 %v888_v54, %v887_v53  ;;  %v1392_v51 = vpack.c.bf16 %v535_v48, %v533_v47  ;;  %v537_v53 = vld [vmem:[%s2091_s3 + $0xc0] sm:$0xff]  ;;  %v539_v54 = vld [vmem:[%s2091_s3 + $0xd0] sm:$0xff] }
  0x28   :  { %1303 = vmatpush3.bf16.msra.mxu0 %v1302_v56  ;;  %v889_v56 = vld [vmem:[%s2088_s1 + $0x230] sm:$0xff] }
  0x29   :  { %1304 = vmatprep.subr.bf16.mxu0 %v1461_v0  ;;  %v1356_v58 = vpack.c.bf16 %v890_v57, %v889_v56  ;;  %v882_v56 = vld [vmem:[%s2090_s2 + $0x3] ss:$0 sm:$0xff] }
  0x2c   :  { %1306 = vmatpush3.bf16.msra.mxu0 %v1305_v59  ;;  %v891_v59 = vld [vmem:[%s2088_s1 + $0x240] sm:$0xff] }
  0x2d   :  { %1307 = vmatprep.subr.bf16.mxu0 %v1461_v0  ;;  %v1359_v61 = vpack.c.bf16 %v892_v60, %v891_v59 }
  0x30   :  { %1309 = vmatpush3.bf16.msra.mxu0 %v1308_v62  ;;  %v893_v62 = vld [vmem:[%s2088_s1 + $0x250] sm:$0xff] }
  0x31   :  { %1310 = vmatprep.subr.bf16.mxu0 %v1461_v0  ;;  %v1362_v1 = vpack.c.bf16 %v894_v63, %v893_v62  ;;  %v544_v62 = vld [vmem:[%s2091_s3 + $0xf8] sm:$0xff] }
  0x34   :  { %1312 = vmatpush3.bf16.msra.mxu0 %v1311_v2  ;;  %v895_v2 = vld [vmem:[%s2088_s1 + $0x260] sm:$0xff] }
  0x35   :  { %1313 = vmatprep.subr.bf16.mxu0 %v1461_v0  ;;  %v1365_v5 = vpack.c.bf16 %v896_v3, %v895_v2  ;;  %v543_v2 = vld [vmem:[%s2091_s3 + $0xf0] sm:$0xff] }
  0x38   :  { %1315 = vmatpush3.bf16.msra.mxu0 %v1314_v6  ;;  %v864_v6 = vld [vmem:[%s2090_s2 + $0x2] ss:$0 sm:$0xff] }
  0x39   :  { %1316 = vmatprep.subr.bf16.mxu0 %v1461_v0 }
  0x3c   :  { %1318 = vmatpush3.bf16.msra.mxu0 %v1317_v9 }
  0x3d   :  { %1319 = vmatprep.subr.bf16.mxu0 %v1461_v0 }
  0x40   :  { %1321 = vmatpush3.bf16.msra.mxu0 %v1320_v17 }
  0x41   :  { %1346 = vmatprep.subr.bf16.mxu0 %v1461_v0 }
  0xf6   :  { %v122_v11 = vpop.f32.mrb[0].mxu0 }
  0xf7   :  { %v123_v12 = vadd.f32 %v828_v10, %v122_v11  ;;  %v1074_v13 = vpop.f32.mrb[1].mxu0  ;;  %v897_v11 = vld [vmem:[%s2088_s1 + $0x270] sm:$0xff] }
  0xf9   :  { %v126_v14 = vmax.f32 %v123_v12, 0.0  ;;  %v898_v12 = vld [vmem:[%s2088_s1 + $0x278] sm:$0xff] }
  0xfa   :  { %v1368_v13 = vpack.c.bf16 %v898_v12, %v897_v11  ;;  %v639_v11 = vld [vmem:[%s2092_s5 + $0x98] sm:$0xff] }
  0xfb   :  { %1108 = vmatmul.mubr.f32.vlgmr.msra.gmra.mrb[0].mxu1 %v126_v14  ;;  %v514_v14 = vld [vmem:[%s2091_s3 + $0x8] sm:$0xff] }
  0xfc   :  { %1177 = vmatprep.mubr.msk.f32.mxu1 %vm1462_vm0, %v1463_v4  ;;  %1324 = vmatpush3.bf16.msra.mxu1 %v1323_v21  ;;  %v1370_v17 = vpack.c.bf16 %v516_v15, %v514_v14  ;;  %v1372_v21 = vpack.c.bf16 %v515_v18, %v513_v16  ;;  %v622_v14 = vld [vmem:[%s2092_s5 + $0x10] sm:$0xff]  ;;  %v623_v15 = vld [vmem:[%s2092_s5 + $0x18] sm:$0xff]  ;;  %v640_v16 = vld [vmem:[%s2092_s5 + $0xa0] sm:$0xff] }
  0xfd   :  { %1325 = vmatprep.subr.bf16.mxu1 %v1461_v0  ;;  %v1408_v18 = vpack.c.bf16 %v623_v15, %v622_v14  ;;  %v512_v14 = vld [vmem:[%s2094_s4 + $0x8] sm:$0xff] }
 0x100   :  { %1327 = vmatpush3.bf16.msra.mxu1 %v1326_v23  ;;  %v517_v23 = vld [vmem:[%s2091_s3 + $0x20] sm:$0xff] }
 0x101   :  { %1328 = vmatprep.subr.bf16.mxu1 %v1461_v0  ;;  %v1376_v27 = vpack.c.bf16 %v519_v24, %v517_v23  ;;  %v643_v23 = vld [vmem:[%s2092_s5 + $0xb8] sm:$0xff] }
 0x104   :  { %1330 = vmatpush3.bf16.msra.mxu1 %v1329_v26  ;;  %v524_v26 = vld [vmem:[%s2091_s3 + $0x58] sm:$0xff] }
 0x105   :  { %1331 = vmatprep.subr.bf16.mxu1 %v1461_v0  ;;  %v1378_v28 = vpack.c.bf16 %v524_v26, %v522_v25  ;;  %v626_v26 = vld [vmem:[%s2092_s5 + $0x30] sm:$0xff] }
 0x108   :  { %1333 = vmatpush3.bf16.msra.mxu1 %v1332_v29  ;;  %v521_v29 = vld [vmem:[%s2091_s3 + $0x40] sm:$0xff] }
 0x109   :  { %1334 = vmatprep.subr.bf16.mxu1 %v1461_v0  ;;  %v1380_v33 = vpack.c.bf16 %v523_v30, %v521_v29  ;;  %v645_v29 = vld [vmem:[%s2092_s5 + $0xc8] sm:$0xff] }
 0x10c   :  { %1336 = vmatpush3.bf16.msra.mxu1 %v1335_v32  ;;  %v528_v32 = vld [vmem:[%s2091_s3 + $0x78] sm:$0xff] }
 0x10d   :  { %1337 = vmatprep.subr.bf16.mxu1 %v1461_v0  ;;  %v1382_v34 = vpack.c.bf16 %v528_v32, %v526_v31  ;;  %v628_v32 = vld [vmem:[%s2092_s5 + $0x40] sm:$0xff] }
 0x110   :  { %1339 = vmatpush3.bf16.msra.mxu1 %v1338_v35  ;;  %v525_v35 = vld [vmem:[%s2091_s3 + $0x60] sm:$0xff] }
 0x111   :  { %1340 = vmatprep.subr.bf16.mxu1 %v1461_v0 }
 0x114   :  { %1342 = vmatpush3.bf16.msra.mxu1 %v1341_v38  ;;  %v532_v38 = vld [vmem:[%s2091_s3 + $0x98] sm:$0xff] }
 0x115   :  { %1343 = vmatprep.subr.bf16.mxu1 %v1461_v0 }
 0x118   :  { %1345 = vmatpush3.bf16.msra.mxu1 %v1344_v46 }
 0x119   :  { %1371 = vmatprep.subr.bf16.mxu1 %v1370_v17  ;;  %v641_v17 = vld [vmem:[%s2092_s5 + $0xa8] sm:$0xff] }
 0x11a   :  { %v1410_v19 = vpack.c.bf16 %v641_v17, %v640_v16 }
 0x1ce   :  { %v218_v40 = vpop.f32.mrb[0].mxu1 }
 0x1cf   :  { %v219_v41 = vadd.f32 %v846_v39, %v218_v40  ;;  %v1109_v42 = vpop.f32.mrb[1].mxu1  ;;  %v1384_v39 = vpack.c.bf16 %v527_v36, %v525_v35  ;;  %v1386_v40 = vpack.c.bf16 %v532_v38, %v530_v37  ;;  %v647_v35 = vld [vmem:[%s2092_s5 + $0xd8] sm:$0xff]  ;;  %v630_v38 = vld [vmem:[%s2092_s5 + $0x50] sm:$0xff] }
 0x1d0   :  { %v531_v42 = vld [vmem:[%s2091_s3 + $0x90] sm:$0xff] }
 0x1d1   :  { %v222_v43 = vmax.f32 %v219_v41, 0.0  ;;  %v529_v41 = vld [vmem:[%s2091_s3 + $0x80] sm:$0xff] }
 0x1d2   :  { %v1388_v45 = vpack.c.bf16 %v531_v42, %v529_v41  ;;  %v649_v41 = vld [vmem:[%s2092_s5 + $0xe8] sm:$0xff] }
 0x1d3   :  { %1143 = vmatmul.mubr.f32.vlgmr.msra.gmra.mrb[2].mxu0 %v222_v43  ;;  %v534_v43 = vld [vmem:[%s2091_s3 + $0xa8] sm:$0xff] }
 0x1d4   :  { %1212 = vmatprep.mubr.msk.f32.mxu0 %vm1462_vm0, %v1463_v4  ;;  %1348 = vmatpush3.bf16.msra.mxu0 %v1347_v50  ;;  %v1390_v46 = vpack.c.bf16 %v536_v44, %v534_v43  ;;  %v540_v50 = vld [vmem:[%s2091_s3 + $0xd8] sm:$0xff]  ;;  %v900_v44 = vld [vmem:[%s2090_s2 + $0x4] ss:$0 sm:$0xff] }
 0x1d5   :  { %1349 = vmatprep.subr.bf16.mxu0 %v1461_v0 }
 0x1d8   :  { %1351 = vmatpush3.bf16.msra.mxu0 %v1350_v52  ;;  %v1394_v52 = vpack.c.bf16 %v540_v50, %v538_v49  ;;  %v632_v49 = vld [vmem:[%s2092_s5 + $0x60] sm:$0xff]  ;;  %v633_v50 = vld [vmem:[%s2092_s5 + $0x68] sm:$0xff] }
 0x1d9   :  { %1352 = vmatprep.subr.bf16.mxu0 %v1461_v0 }
 0x1dc   :  { %1354 = vmatpush3.bf16.msra.mxu0 %v1353_v55  ;;  %v1396_v55 = vpack.c.bf16 %v539_v54, %v537_v53  ;;  %v651_v53 = vld [vmem:[%s2092_s5 + $0xf8] sm:$0xff] }
 0x1dd   :  { %1355 = vmatprep.subr.bf16.mxu0 %v1461_v0 }
 0x1e0   :  { %1357 = vmatpush3.bf16.msra.mxu0 %v1356_v58 }
 0x1e1   :  { %1358 = vmatprep.subr.bf16.mxu0 %v1461_v0 }
 0x1e4   :  { %1360 = vmatpush3.bf16.msra.mxu0 %v1359_v61  ;;  %v542_v61 = vld [vmem:[%s2091_s3 + $0xe8] sm:$0xff] }
 0x1e5   :  { %1361 = vmatprep.subr.bf16.mxu0 %v1461_v0  ;;  %v1398_v63 = vpack.c.bf16 %v544_v62, %v542_v61  ;;  %v733_v61 = vld [vmem:[%s2093_s7 + $0x18] sm:$0xff] }
 0x1e8   :  { %1363 = vmatpush3.bf16.msra.mxu0 %v1362_v1  ;;  %v541_v1 = vld [vmem:[%s2091_s3 + $0xe0] sm:$0xff] }
 0x1e9   :  { %1364 = vmatprep.subr.bf16.mxu0 %v1461_v0  ;;  %v1400_v3 = vpack.c.bf16 %v543_v2, %v541_v1  ;;  %v735_v1 = vld [vmem:[%s2093_s7 + $0x28] sm:$0xff] }
 0x1ec   :  { %1366 = vmatpush3.bf16.msra.mxu0 %v1365_v5  ;;  %v636_v5 = vld [vmem:[%s2092_s5 + $0x80] sm:$0xff] }
 0x1ed   :  { %1367 = vmatprep.subr.bf16.mxu0 %v1461_v0 }
 0x1f0   :  { %1369 = vmatpush3.bf16.msra.mxu0 %v1368_v13 }
 0x2a6   :  { %v314_v7 = vpop.f32.mrb[2].mxu0 }
 0x2a7   :  { %v315_v8 = vadd.f32 %v864_v6, %v314_v7  ;;  %v1144_v9 = vpop.f32.mrb[3].mxu0  ;;  %v637_v6 = vld [vmem:[%s2092_s5 + $0x88] sm:$0xff]  ;;  %v620_v7 = vld [vmem:[%s2092_s5] sm:$0xff] }
 0x2a8   :  { %v621_v9 = vld [vmem:[%s2092_s5 + $0x8] sm:$0xff] }
 0x2a9   :  { %v318_v10 = vmax.f32 %v315_v8, 0.0  ;;  %v1402_v8 = vpack.c.bf16 %v637_v6, %v636_v5  ;;  %v1404_v12 = vpack.c.bf16 %v621_v9, %v620_v7  ;;  %v737_v5 = vld [vmem:[%s2093_s7 + $0x38] sm:$0xff]  ;;  %v738_v7 = vld [vmem:[%s2093_s7 + $0x40] sm:$0xff] }
 0x2ab   :  { %1178 = vmatmul.mubr.f32.vlgmr.msra.gmra.mrb[2].mxu1 %v318_v10  ;;  %v638_v10 = vld [vmem:[%s2092_s5 + $0x90] sm:$0xff]  ;;  %1403 = vmatprep.subr.bf16.mxu0 %v1402_v8  ;;  %v739_v8 = vld [vmem:[%s2093_s7 + $0x48] sm:$0xff] }
 0x2ac   :  { %609 = vmatprep.mubr.f32.mxu1 %v1463_v4  ;;  %1373 = vmatpush1.bf16.msra.mxu1 %v1372_v21  ;;  %v1406_v13 = vpack.c.bf16 %v639_v11, %v638_v10  ;;  %v625_v21 = vld [vmem:[%s2092_s5 + $0x28] sm:$0xff]  ;;  %v1447_v9 = vpack.c.bf16 %v739_v8, %v738_v7  ;;  %v740_v10 = vld [vmem:[%s2093_s7 + $0x50] sm:$0xff]  ;;  %v741_v11 = vld [vmem:[%s2093_s7 + $0x58] sm:$0xff] }
 0x2ad   :  { %1375 = vmatprep.subr.bf16.mxu1 %v1374_v22  ;;  %v642_v22 = vld [vmem:[%s2092_s5 + $0xb0] sm:$0xff]  ;;  %v1412_v24 = vpack.c.bf16 %v625_v21, %v624_v20  ;;  %v742_v21 = vld [vmem:[%s2093_s7 + $0x60] sm:$0xff] }
 0x2ae   :  { %v1414_v25 = vpack.c.bf16 %v643_v23, %v642_v22  ;;  %v743_v22 = vld [vmem:[%s2093_s7 + $0x68] sm:$0xff] }
 0x2af   :  { %v1453_v23 = vpack.c.bf16 %v743_v22, %v742_v21 }
 0x2b0   :  { %1377 = vmatpush1.bf16.msra.mxu1 %v1376_v27  ;;  %v627_v27 = vld [vmem:[%s2092_s5 + $0x38] sm:$0xff] }
 0x2b1   :  { %1379 = vmatprep.subr.bf16.mxu1 %v1378_v28  ;;  %v644_v28 = vld [vmem:[%s2092_s5 + $0xc0] sm:$0xff]  ;;  %v1416_v30 = vpack.c.bf16 %v627_v27, %v626_v26 }
 0x2b2   :  { %v1418_v31 = vpack.c.bf16 %v645_v29, %v644_v28  ;;  %v901_v28 = vld [vmem:[%s2095_s6] ss:$0 sm:$0xff] }
 0x2b4   :  { %1381 = vmatpush1.bf16.msra.mxu1 %v1380_v33  ;;  %v629_v33 = vld [vmem:[%s2092_s5 + $0x48] sm:$0xff] }
 0x2b5   :  { %1383 = vmatprep.subr.bf16.mxu1 %v1382_v34  ;;  %v646_v34 = vld [vmem:[%s2092_s5 + $0xd0] sm:$0xff]  ;;  %v1420_v36 = vpack.c.bf16 %v629_v33, %v628_v32 }
 0x2b6   :  { %v1422_v37 = vpack.c.bf16 %v647_v35, %v646_v34 }
 0x2b8   :  { %1385 = vmatpush1.bf16.msra.mxu1 %v1384_v39  ;;  %v631_v39 = vld [vmem:[%s2092_s5 + $0x58] sm:$0xff] }
 0x2b9   :  { %1387 = vmatprep.subr.bf16.mxu1 %v1386_v40  ;;  %v648_v40 = vld [vmem:[%s2092_s5 + $0xe0] sm:$0xff]  ;;  %v1424_v42 = vpack.c.bf16 %v631_v39, %v630_v38 }
 0x2ba   :  { %v1426_v43 = vpack.c.bf16 %v649_v41, %v648_v40 }
 0x2bc   :  { %1389 = vmatpush1.bf16.msra.mxu1 %v1388_v45 }
 0x2bd   :  { %1391 = vmatprep.subr.bf16.mxu1 %v1390_v46 }
 0x2c0   :  { %1393 = vmatpush1.bf16.msra.mxu1 %v1392_v51  ;;  %v1428_v51 = vpack.c.bf16 %v633_v50, %v632_v49 }
 0x2c1   :  { %1395 = vmatprep.subr.bf16.mxu1 %v1394_v52  ;;  %v650_v52 = vld [vmem:[%s2092_s5 + $0xf0] sm:$0xff] }
 0x2c2   :  { %v1430_v54 = vpack.c.bf16 %v651_v53, %v650_v52 }
 0x2c4   :  { %1397 = vmatpush1.bf16.msra.mxu1 %v1396_v55  ;;  %v635_v55 = vld [vmem:[%s2092_s5 + $0x78] sm:$0xff] }
 0x2c5   :  { %1399 = vmatprep.subr.bf16.mxu1 %v1398_v63  ;;  %v734_v63 = vld [vmem:[%s2093_s7 + $0x20] sm:$0xff] }
 0x2c6   :  { %v1441_v2 = vpack.c.bf16 %v735_v1, %v734_v63 }
 0x2c8   :  { %1401 = vmatpush1.bf16.msra.mxu1 %v1400_v3  ;;  %v736_v3 = vld [vmem:[%s2093_s7 + $0x30] sm:$0xff] }
 0x2c9   :  { %1434 = vmatprep.subr.bf16.mxu1 %v1461_v0  ;;  %v1444_v6 = vpack.c.bf16 %v737_v5, %v736_v3 }
 0x37e   :  { %v410_v57 = vpop.f32.mrb[2].mxu1 }
 0x37f   :  { %v411_v58 = vadd.f32 %v882_v56, %v410_v57  ;;  %v1179_v59 = vpop.f32.mrb[3].mxu1  ;;  %v730_v57 = vld [vmem:[%s2093_s7] sm:$0xff] }
 0x380   :  { %v732_v59 = vld [vmem:[%s2093_s7 + $0x10] sm:$0xff] }
 0x381   :  { %v414_v60 = vmax.f32 %v411_v58, 0.0  ;;  %v731_v58 = vld [vmem:[%s2093_s7 + $0x8] sm:$0xff]  ;;  %v1438_v62 = vpack.c.bf16 %v733_v61, %v732_v59 }
 0x383   :  { %1213 = vmatmul.mubr.f32.vlgmr.msra.gmra.mrb[4].mxu0 %v414_v60  ;;  %v1435_v60 = vpack.c.bf16 %v731_v58, %v730_v57 }
 0x384   :  { %1405 = vmatpush3.bf16.msra.mxu0 %v1404_v12  ;;  %v1450_v12 = vpack.c.bf16 %v741_v11, %v740_v10 }
 0x385   :  { %1407 = vmatprep.subr.bf16.mxu0 %v1406_v13  ;;  %v511_v13 = vld [vmem:[%s2094_s4] sm:$0xff] }
 0x388   :  { %1409 = vmatpush3.bf16.msra.mxu0 %v1408_v18 }
 0x389   :  { %1411 = vmatprep.subr.bf16.mxu0 %v1410_v19 }
 0x38c   :  { %1413 = vmatpush3.bf16.msra.mxu0 %v1412_v24  ;;  %v744_v24 = vld [vmem:[%s2093_s7 + $0x70] sm:$0xff] }
 0x38d   :  { %1415 = vmatprep.subr.bf16.mxu0 %v1414_v25  ;;  %v745_v25 = vld [vmem:[%s2093_s7 + $0x78] sm:$0xff] }
 0x38e   :  { %v1456_v26 = vpack.c.bf16 %v745_v25, %v744_v24 }
 0x390   :  { %1417 = vmatpush3.bf16.msra.mxu0 %v1416_v30 }
 0x391   :  { %1419 = vmatprep.subr.bf16.mxu0 %v1418_v31 }
 0x394   :  { %1421 = vmatpush3.bf16.msra.mxu0 %v1420_v36 }
 0x395   :  { %1423 = vmatprep.subr.bf16.mxu0 %v1422_v37 }
 0x398   :  { %1425 = vmatpush3.bf16.msra.mxu0 %v1424_v42 }
 0x399   :  { %1427 = vmatprep.subr.bf16.mxu0 %v1426_v43 }
 0x39c   :  { %1429 = vmatpush3.bf16.msra.mxu0 %v1428_v51 }
 0x39d   :  { %1431 = vmatprep.subr.bf16.mxu0 %v1430_v54 }
 0x456   :  { %v506_v45 = vpop.f32.mrb[4].mxu0 }
 0x457   :  { %v507_v46 = vadd.f32 %v900_v44, %v506_v45  ;;  %v1214_v47 = vpop.f32.mrb[5].mxu0 }
 0x459   :  { %v510_v48 = vmax.f32 %v507_v46, 0.0 }
 0x45b   :  { %610 = vmatmul.mubr.f32.vlgmr.msra.gmra.mrb[4].mxu1 %v510_v48 }
 0x45c   :  { %1247 = vmatprep.mubr.msk.f32.mxu1 %vm1462_vm0, %v1463_v4  ;;  %v634_v4 = vld [vmem:[%s2092_s5 + $0x70] sm:$0xff]  ;;  %1436 = vmatpush3.bf16.msra.mxu1 %v1435_v60 }
 0x45d   :  { %v1432_v56 = vpack.c.bf16 %v635_v55, %v634_v4  ;;  %1437 = vmatprep.subr.bf16.mxu1 %v1461_v0 }
 0x45f   :  { %1433 = vmatpush3.bf16.msra.mxu0 %v1432_v56 }
 0x460   :  { %1439 = vmatpush3.bf16.msra.mxu1 %v1438_v62 }
 0x461   :  { %1440 = vmatprep.subr.bf16.mxu1 %v1461_v0 }
 0x464   :  { %1442 = vmatpush3.bf16.msra.mxu1 %v1441_v2 }
 0x465   :  { %1443 = vmatprep.subr.bf16.mxu1 %v1461_v0 }
 0x468   :  { %1445 = vmatpush3.bf16.msra.mxu1 %v1444_v6 }
 0x469   :  { %1446 = vmatprep.subr.bf16.mxu1 %v1461_v0 }
 0x46c   :  { %1448 = vmatpush3.bf16.msra.mxu1 %v1447_v9 }
 0x46d   :  { %1449 = vmatprep.subr.bf16.mxu1 %v1461_v0 }
 0x470   :  { %1451 = vmatpush3.bf16.msra.mxu1 %v1450_v12 }
 0x471   :  { %1452 = vmatprep.subr.bf16.mxu1 %v1461_v0 }
 0x474   :  { %1454 = vmatpush3.bf16.msra.mxu1 %v1453_v23 }
 0x475   :  { %1455 = vmatprep.subr.bf16.mxu1 %v1461_v0  ;;  %v902_v0 = vld [vmem:[%s2096_s8] ss:$0 sm:$0xff] }
 0x478   :  { %1457 = vmatpush3.bf16.msra.mxu1 %v1456_v26 }
 0x52e   :  { %v611_v15 = vpop.f32.mrb[4].mxu1 }
 0x52f   :  { %v616_v16 = vadd.f32 %v611_v15, %v511_v13  ;;  %v613_v17 = vpop.f32.mrb[5].mxu1 }
 0x530   :  { %v617_v18 = vadd.f32 %v613_v17, %v512_v14 }
 0x531   :  { %v618_v20 = vmax.f32 %v616_v16, 0.0 }
 0x532   :  { %v619_v19 = vmax.f32 %v617_v18, 0.0 }
 0x534   :  { %723 = vmatprep.mubr.f32.mxu0 %v619_v19 }
 0x535   :  { %724 = vmatmul.mubr.f32.vlgmr.msra.gmra.mrb[6].mxu0 %v618_v20 }
 0x608   :  { %v1020_v27 = vpop.f32.mrb[6].mxu0 }
 0x609   :  { %v1021_v29 = vpop.f32.mrb[7].mxu0 }
 0x60a   :  { %v1022_v30 = vadd.f32 %v1021_v29, %v1020_v27 }
 0x60c   :  { %v726_v31 = vadd.f32 %v1022_v30, %v901_v28 }
 0x60e   :  { %v729_v32 = vmax.f32 %v726_v31, 0.0 }
 0x610   :  { %1248 = vmatmul.mubr.f32.vlgmr.msra.gmra.mrb[6].mxu1 %v729_v32 }
 0x6e3   :  { %v819_v33 = vpop.f32.mrb[6].mxu1 }
 0x6e4   :  { %v820_v34 = vadd.f32 %v902_v0, %v819_v33  ;;  %v1249_v35 = vpop.f32.mrb[7].mxu1 }
 0x6e6   :  { %823 = vst [vmem:[%s2097_s9] sm:$0xff] %v820_v34 }

</bundles_post_ra>
